<compile_context>
chip_gen: v5e
topology: v5e:2x2
jax: 0.10.0
libtpu: 0.0.40
codegen_flags: <defaults>
</compile_context>

<pallas_src>
import functools

import jax
import jax.numpy as jnp
from jax.experimental import pallas as pl
from jax.experimental.pallas import tpu as pltpu


# ---------------------------------------------------------------------------
# helpers
# ---------------------------------------------------------------------------
def _round_up(v, m):
    return (v + m - 1) // m * m


def _clamp_vmem(estimate_bytes):
    # Keep the scoped-VMEM request inside the smallest physical VMEM (v7x: 64 MiB/TC),
    # but never below a comfortable floor so the compiler is free to double-buffer.
    return int(min(max(estimate_bytes, 32 * 1024 * 1024), 48 * 1024 * 1024))


# ---------------------------------------------------------------------------
# Tiled linear kernels (shared by QKV projection and output projection)
# ---------------------------------------------------------------------------
def _matmul_kernel(x_ref, w_ref, o_ref, acc_ref):
    @pl.when(pl.program_id(2) == 0)
    def _init():
        acc_ref[...] = jnp.zeros_like(acc_ref)

    acc_ref[...] += jnp.dot(
        x_ref[...], w_ref[...], preferred_element_type=jnp.float32
    )

    @pl.when(pl.program_id(2) == pl.num_programs(2) - 1)
    def _store():
        o_ref[...] = acc_ref[...].astype(o_ref.dtype)


def _matmul_bias_kernel(x_ref, w_ref, b_ref, o_ref, acc_ref):
    @pl.when(pl.program_id(2) == 0)
    def _init():
        acc_ref[...] = jnp.zeros_like(acc_ref)

    acc_ref[...] += jnp.dot(
        x_ref[...], w_ref[...], preferred_element_type=jnp.float32
    )

    @pl.when(pl.program_id(2) == pl.num_programs(2) - 1)
    def _store():
        o_ref[...] = (acc_ref[...] + b_ref[...].astype(jnp.float32)).astype(o_ref.dtype)


def _pallas_linear(x, w, bias=None, *, tm=256, tk=256, tn=256):
    """x: (M, K) @ w: (K, N) [+ bias (N,)] -> (M, N), tiled and pipelined.

    Shapes are zero-padded up to tile multiples (zero padding is exact for a
    matmul) and the result is sliced back, so arbitrary M/K/N are supported.
    Tile sizes (256) keep double-buffered input/output tiles + the f32
    accumulator well under v7x's 64 MiB VMEM while staying near the HBM
    roofline on v5e/v6e.
    """
    M, K = x.shape
    Kw, N = w.shape
    assert K == Kw, (K, Kw)

    tm = min(tm, _round_up(M, 8))
    tk = min(tk, _round_up(K, 128))
    tn = min(tn, _round_up(N, 128))
    Mp, Kp, Np = _round_up(M, tm), _round_up(K, tk), _round_up(N, tn)

    if (Mp, Kp) != (M, K):
        x = jnp.pad(x, ((0, Mp - M), (0, Kp - K)))
    if (Kp, Np) != (K, N):
        w = jnp.pad(w, ((0, Kp - K), (0, Np - N)))

    in_specs = [
        pl.BlockSpec((tm, tk), lambda i, j, k: (i, k)),
        pl.BlockSpec((tk, tn), lambda i, j, k: (k, j)),
    ]
    args = [x, w]
    if bias is not None:
        b = bias.reshape(1, N)
        if Np != N:
            b = jnp.pad(b, ((0, 0), (0, Np - N)))
        in_specs.append(pl.BlockSpec((1, tn), lambda i, j, k: (0, j)))
        args.append(b)
        kernel = _matmul_bias_kernel
    else:
        kernel = _matmul_kernel

    itemsize = jnp.dtype(x.dtype).itemsize
    vmem_est = (
        2 * (tm * tk + tk * tn + tm * tn + tn) * itemsize  # double-buffered tiles
        + tm * tn * 4                                      # f32 accumulator
        + (2 << 20)                                        # headroom
    )

    out = pl.pallas_call(
        kernel,
        out_shape=jax.ShapeDtypeStruct((Mp, Np), x.dtype),
        grid_spec=pltpu.PrefetchScalarGridSpec(
            num_scalar_prefetch=0,
            grid=(Mp // tm, Np // tn, Kp // tk),   # reduction axis last
            in_specs=in_specs,
            out_specs=pl.BlockSpec((tm, tn), lambda i, j, k: (i, j)),
            scratch_shapes=[pltpu.VMEM((tm, tn), jnp.float32)],
        ),
        compiler_params=pltpu.CompilerParams(
            dimension_semantics=("parallel", "parallel", "arbitrary"),
            vmem_limit_bytes=_clamp_vmem(vmem_est),
        ),
    )(*args)

    if (Mp, Np) != (M, N):
        out = out[:M, :N]
    return out


# ---------------------------------------------------------------------------
# Attention core: flash-style online softmax, all heads per step
# ---------------------------------------------------------------------------
def _flash_attn_kernel(q_ref, k_ref, v_ref, o_ref, m_sc, l_sc, acc_sc, *,
                       heads, dim_head, scale, n_tokens, tk, mask_cols):
    """Blocks: q_ref (1, tq, H*D), k_ref/v_ref (1, tk, H*D), o_ref (1, tq, H*D).

    q/k/v come from the same fused qkv tensor; their BlockSpecs select lane
    blocks 0/1/2, so the split never touches HBM. Softmax is computed online
    across the kv grid axis with per-head f32 accumulators (m, l, acc) in VMEM.
    The output is written once, lane-dense, already merged over heads.
    """
    ki = pl.program_id(2)

    @pl.when(ki == 0)
    def _init():
        m_sc[...] = jnp.full(m_sc.shape, -1e30, dtype=m_sc.dtype)
        l_sc[...] = jnp.zeros_like(l_sc)
        acc_sc[...] = jnp.zeros_like(acc_sc)

    q_all = q_ref[0] * scale                          # (tq, H*D); scale q, not scores
    k_all = k_ref[0]                                  # (tk, H*D)
    v_all = v_ref[0]                                  # (tk, H*D)

    if mask_cols:
        col = jax.lax.broadcasted_iota(jnp.int32, (1, tk), 1) + ki * tk
        valid = col < n_tokens                        # mask zero-padded key rows

    for h in range(heads):
        lo = h * dim_head
        hi = lo + dim_head
        q = q_all[:, lo:hi]                           # (tq, D)
        k = k_all[:, lo:hi]                           # (tk, D)
        v = v_all[:, lo:hi]                           # (tk, D)

        s = jnp.dot(q, k.T, preferred_element_type=jnp.float32)     # (tq, tk)
        if mask_cols:
            s = jnp.where(valid, s, -1e30)

        m_prev = m_sc[h]                              # (tq, 1)
        m_new = jnp.maximum(m_prev, jnp.max(s, axis=-1, keepdims=True))
        alpha = jnp.exp(m_prev - m_new)
        p = jnp.exp(s - m_new)
        l_sc[h] = alpha * l_sc[h] + jnp.sum(p, axis=-1, keepdims=True)
        acc_sc[h] = alpha * acc_sc[h] + jnp.dot(
            p.astype(v.dtype), v, preferred_element_type=jnp.float32
        )
        m_sc[h] = m_new

    @pl.when(ki == pl.num_programs(2) - 1)
    def _store():
        # approx reciprocal runs on the EUP slot (otherwise idle in this phase);
        # single lane-dense store of the merged-head tile.
        outs = [
            acc_sc[h] * pl.reciprocal(l_sc[h], approx=True) for h in range(heads)
        ]
        o_ref[0] = jnp.concatenate(outs, axis=-1).astype(o_ref.dtype)


def _pallas_attention(qkv, *, heads, dim_head, scale):
    """qkv: (B, N, 3*H*D) -> (B, N, H*D) attention output (heads merged)."""
    B, N, three_inner = qkv.shape
    inner = heads * dim_head
    assert three_inner == 3 * inner
    # TODO(synk): lane-block q/k/v split requires heads*dim_head % 128 == 0
    # (true for standard ViT configs); otherwise pad dim_head.
    assert inner % 128 == 0, "heads*dim_head must be a multiple of 128"

    t = min(128, _round_up(N, 8))            # q-tile == kv-tile size
    Np = _round_up(N, t)
    if Np != N:
        qkv = jnp.pad(qkv, ((0, 0), (0, Np - N), (0, 0)))

    itemsize = jnp.dtype(qkv.dtype).itemsize
    vmem_est = (
        2 * 4 * t * inner * itemsize                 # double-buffered q,k,v,out blocks
        + heads * t * (dim_head + 2) * 4             # f32 accumulators
        + 4 * t * t * 4                              # score / prob temporaries
        + (4 << 20)
    )

    kernel = functools.partial(
        _flash_attn_kernel, heads=heads, dim_head=dim_head, scale=scale,
        n_tokens=N, tk=t, mask_cols=(Np != N),
    )

    out = pl.pallas_call(
        kernel,
        out_shape=jax.ShapeDtypeStruct((B, Np, inner), qkv.dtype),
        grid_spec=pltpu.PrefetchScalarGridSpec(
            num_scalar_prefetch=0,
            grid=(B, Np // t, Np // t),              # kv reduction axis last
            in_specs=[
                # lane-block 0 = q, 1 = k, 2 = v of the fused qkv tensor
                pl.BlockSpec((1, t, inner), lambda b, qi, ki: (b, qi, 0)),
                pl.BlockSpec((1, t, inner), lambda b, qi, ki: (b, ki, 1)),
                pl.BlockSpec((1, t, inner), lambda b, qi, ki: (b, ki, 2)),
            ],
            out_specs=pl.BlockSpec((1, t, inner), lambda b, qi, ki: (b, qi, 0)),
            scratch_shapes=[
                pltpu.VMEM((heads, t, 1), jnp.float32),        # running max
                pltpu.VMEM((heads, t, 1), jnp.float32),        # running denom
                pltpu.VMEM((heads, t, dim_head), jnp.float32),  # running numerator
            ],
        ),
        compiler_params=pltpu.CompilerParams(
            dimension_semantics=("parallel", "parallel", "arbitrary"),
            vmem_limit_bytes=_clamp_vmem(vmem_est),
        ),
    )(qkv, qkv, qkv)

    if Np != N:
        out = out[:, :N, :]
    return out


# ---------------------------------------------------------------------------
# Forward (mirror of PyTorch Attention.forward; Dropout(0.0) == identity)
# ---------------------------------------------------------------------------
def attention_forward(x, w_qkv_t, w_out_t, b_out, *, heads, dim_head):
    """x: (B, N, dim)
    w_qkv_t: (dim, 3*inner)  -- to_qkv weight, pre-transposed once outside jit
    w_out_t: (inner, dim)    -- to_out[0] weight, pre-transposed once outside jit
    b_out:   (dim,)
    """
    B, N, dim = x.shape
    inner = heads * dim_head
    scale = float(dim_head) ** -0.5

    # NOTE: on v6e/v7x, casting x / weights to bf16 here (f32 accumulation kept in
    # the kernels) roughly doubles MXU throughput and halves HBM traffic; kept f32
    # to match the f32 reference check.

    # 1) QKV projection (tiled, pipelined matmul)
    qkv = _pallas_linear(x.reshape(B * N, dim), w_qkv_t)       # (B*N, 3*inner)
    qkv = qkv.reshape(B, N, 3 * inner)                         # free reshape

    # 2) flash attention: q/k/v split + head split fused into the kernel; output
    #    is already 'b n (h d)' so no transpose before the projection.
    out = _pallas_attention(qkv, heads=heads, dim_head=dim_head, scale=scale)

    # 3) output projection + bias (project_out=True); Dropout(0.0) = identity
    out = _pallas_linear(out.reshape(B * N, inner), w_out_t, bias=b_out)
    return out.reshape(B, N, dim)


# ---------------------------------------------------------------------------
# Pure-JAX reference (torch weight layout)
# ---------------------------------------------------------------------------
def attention_reference(x, w_qkv, w_out, b_out, *, heads, dim_head):
    B, N, dim = x.shape
    inner = heads * dim_head
    scale = float(dim_head) ** -0.5
    qkv = x @ w_qkv.T
    q, k, v = jnp.split(qkv, 3, axis=-1)
    q = q.reshape(B, N, heads, dim_head).transpose(0, 2, 1, 3)
    k = k.reshape(B, N, heads, dim_head).transpose(0, 2, 1, 3)
    v = v.reshape(B, N, heads, dim_head).transpose(0, 2, 1, 3)
    dots = jnp.einsum("bhnd,bhmd->bhnm", q, k) * scale
    attn = jax.nn.softmax(dots, axis=-1)
    out = jnp.einsum("bhnm,bhmd->bhnd", attn, v)
    out = out.transpose(0, 2, 1, 3).reshape(B, N, inner)
    return out @ w_out.T + b_out


# ---------------------------------------------------------------------------
if __name__ == "__main__":
    B, N, dim = 2, 8, 32
    heads, dim_head = 4, 64
    inner = heads * dim_head

    key = jax.random.PRNGKey(0)
    kx, kq, kw, kb = jax.random.split(key, 4)

    x = jax.random.normal(kx, (B, N, dim), dtype=jnp.float32)
    # torch nn.Linear layout: (out_features, in_features)
    w_qkv = jax.random.normal(kq, (3 * inner, dim), dtype=jnp.float32) * (dim ** -0.5)
    w_out = jax.random.normal(kw, (dim, inner), dtype=jnp.float32) * (inner ** -0.5)
    b_out = jax.random.normal(kb, (dim,), dtype=jnp.float32) * 0.01

    # Pre-transpose the weights ONCE outside jit (no in-graph .T between pallas_calls).
    w_qkv_t = jnp.asarray(w_qkv.T)    # (dim, 3*inner)
    w_out_t = jnp.asarray(w_out.T)    # (inner, dim)

    fwd = jax.jit(
        functools.partial(attention_forward, heads=heads, dim_head=dim_head)
    )
    y = fwd(x, w_qkv_t, w_out_t, b_out)
    jax.block_until_ready(y)

    y_ref = attention_reference(x, w_qkv, w_out, b_out, heads=heads, dim_head=dim_head)
    assert y.shape == (B, N, dim)
    # Tolerance loosened slightly vs the f32 reference because the softmax
    # denominator uses the hardware approximate reciprocal (EUP).
    assert jnp.allclose(y, y_ref, atol=5e-3, rtol=5e-3), "mismatch vs reference"

    print("KERNEL_OK")
</pallas_src>

<mosaic_0001>
module attributes {stable_mosaic.version = 11 : i64} {
  func.func @_matmul_kernel(%arg0: i32, %arg1: i32, %arg2: i32, %arg3: memref<16x128xf32, #tpu.memory_space<vmem>>, %arg4: memref<128x256xf32, #tpu.memory_space<vmem>>, %arg5: memref<16x256xf32, #tpu.memory_space<vmem>>, %arg6: memref<16x256xf32, #tpu.memory_space<vmem>>) attributes {dimension_semantics = [#tpu.dimension_semantics<parallel>, #tpu.dimension_semantics<parallel>, #tpu.dimension_semantics<arbitrary>], iteration_bounds = array<i64: 1, 3, 1>, scalar_prefetch = 0 : i64, scratch_operands = 1 : i64, tpu.core_type = #tpu.core_type<tc>, window_params = [{transform_indices = @transform_0, window_bounds = array<i64: 16, 128>}, {transform_indices = @transform_1, window_bounds = array<i64: 128, 256>}, {transform_indices = @transform_2, window_bounds = array<i64: 16, 256>}]} {
    %c0_i32 = arith.constant 0 : i32
    %0 = arith.cmpi eq, %arg2, %c0_i32 : i32
    %1 = arith.extui %0 : i1 to i32
    %c0_i32_0 = arith.constant 0 : i32
    %2 = arith.cmpi ne, %1, %c0_i32_0 : i32
    scf.if %2 {
      %cst_10 = arith.constant 0.000000e+00 : f32
      %12 = vector.broadcast %cst_10 : f32 to vector<16x256xf32>
      %c0_11 = arith.constant 0 : index
      %c0_12 = arith.constant 0 : index
      %13 = vector.load %arg6[%c0_11, %c0_12] : memref<16x256xf32, #tpu.memory_space<vmem>>, vector<16x256xf32>
      tpu.vector_store %arg6[%c0_11, %c0_12], %12 {strides = array<i32>} : memref<16x256xf32, #tpu.memory_space<vmem>>, vector<16x256xf32>,
    } else {
    }
    %c0 = arith.constant 0 : index
    %c0_1 = arith.constant 0 : index
    %3 = vector.load %arg6[%c0, %c0_1] : memref<16x256xf32, #tpu.memory_space<vmem>>, vector<16x256xf32>
    %c0_2 = arith.constant 0 : index
    %c0_3 = arith.constant 0 : index
    %4 = vector.load %arg3[%c0_2, %c0_3] : memref<16x128xf32, #tpu.memory_space<vmem>>, vector<16x128xf32>
    %c0_4 = arith.constant 0 : index
    %c0_5 = arith.constant 0 : index
    %5 = vector.load %arg4[%c0_4, %c0_5] : memref<128x256xf32, #tpu.memory_space<vmem>>, vector<128x256xf32>
    %cst = arith.constant dense<0.000000e+00> : vector<16x256xf32>
    %6 = tpu.matmul %4, %5, %cst {dimension_numbers = #tpu.dot_dimension_numbers<[1], [0], [0], [1], [0, 0, 1, 1], [], []>} : vector<16x128xf32>, vector<128x256xf32>, vector<16x256xf32> -> vector<16x256xf32>
    %7 = arith.addf %3, %6 : vector<16x256xf32>
    %c0_6 = arith.constant 0 : index
    %c0_7 = arith.constant 0 : index
    %8 = vector.load %arg6[%c0_6, %c0_7] : memref<16x256xf32, #tpu.memory_space<vmem>>, vector<16x256xf32>
    tpu.vector_store %arg6[%c0_6, %c0_7], %7 {strides = array<i32>} : memref<16x256xf32, #tpu.memory_space<vmem>>, vector<16x256xf32>,
    %c0_i32_8 = arith.constant 0 : i32
    %9 = arith.cmpi eq, %arg2, %c0_i32_8 : i32
    %10 = arith.extui %9 : i1 to i32
    %c0_i32_9 = arith.constant 0 : i32
    %11 = arith.cmpi ne, %10, %c0_i32_9 : i32
    scf.if %11 {
      %c0_10 = arith.constant 0 : index
      %c0_11 = arith.constant 0 : index
      %12 = vector.load %arg6[%c0_10, %c0_11] : memref<16x256xf32, #tpu.memory_space<vmem>>, vector<16x256xf32>
      %c0_12 = arith.constant 0 : index
      %c0_13 = arith.constant 0 : index
      %13 = vector.load %arg5[%c0_12, %c0_13] : memref<16x256xf32, #tpu.memory_space<vmem>>, vector<16x256xf32>
      tpu.vector_store %arg5[%c0_12, %c0_13], %12 {strides = array<i32>} : memref<16x256xf32, #tpu.memory_space<vmem>>, vector<16x256xf32>,
    } else {
    }
    return
  }
  func.func @transform_0(%arg0: i32, %arg1: i32, %arg2: i32) -> (i32, i32) {
    %c0_i32 = arith.constant 0 : i32
    return %arg0, %arg2 : i32, i32
  }
  func.func @transform_1(%arg0: i32, %arg1: i32, %arg2: i32) -> (i32, i32) {
    %c0_i32 = arith.constant 0 : i32
    return %arg2, %arg1 : i32, i32
  }
  func.func @transform_2(%arg0: i32, %arg1: i32, %arg2: i32) -> (i32, i32) {
    %c0_i32 = arith.constant 0 : i32
    return %arg0, %arg1 : i32, i32
  }
}

module attributes {stable_mosaic.version = 11 : i64} {
  func.func @_flash_attn_kernel(%arg0: i32, %arg1: i32, %arg2: i32, %arg3: memref<1x8x256xf32, #tpu.memory_space<vmem>>, %arg4: memref<1x8x256xf32, #tpu.memory_space<vmem>>, %arg5: memref<1x8x256xf32, #tpu.memory_space<vmem>>, %arg6: memref<1x8x256xf32, #tpu.memory_space<vmem>>, %arg7: memref<4x8x1xf32, #tpu.memory_space<vmem>>, %arg8: memref<4x8x1xf32, #tpu.memory_space<vmem>>, %arg9: memref<4x8x64xf32, #tpu.memory_space<vmem>>) attributes {dimension_semantics = [#tpu.dimension_semantics<parallel>, #tpu.dimension_semantics<parallel>, #tpu.dimension_semantics<arbitrary>], iteration_bounds = array<i64: 2, 1, 1>, scalar_prefetch = 0 : i64, scratch_operands = 3 : i64, tpu.core_type = #tpu.core_type<tc>, window_params = [{transform_indices = @transform_0, window_bounds = array<i64: 1, 8, 256>}, {transform_indices = @transform_1, window_bounds = array<i64: 1, 8, 256>}, {transform_indices = @transform_2, window_bounds = array<i64: 1, 8, 256>}, {transform_indices = @transform_3, window_bounds = array<i64: 1, 8, 256>}]} {
    %c0_i32 = arith.constant 0 : i32
    %0 = arith.cmpi eq, %arg2, %c0_i32 : i32
    %1 = arith.extui %0 : i1 to i32
    %c0_i32_0 = arith.constant 0 : i32
    %2 = arith.cmpi ne, %1, %c0_i32_0 : i32
    scf.if %2 {
      %cst_96 = arith.constant -1.000000e+30 : f32
      %158 = vector.broadcast %cst_96 : f32 to vector<4x8x1xf32>
      %c0_97 = arith.constant 0 : index
      %c0_98 = arith.constant 0 : index
      %c0_99 = arith.constant 0 : index
      %159 = vector.load %arg7[%c0_97, %c0_98, %c0_99] : memref<4x8x1xf32, #tpu.memory_space<vmem>>, vector<4x8x1xf32>
      tpu.vector_store %arg7[%c0_97, %c0_98, %c0_99], %158 {strides = array<i32>} : memref<4x8x1xf32, #tpu.memory_space<vmem>>, vector<4x8x1xf32>,
      %cst_100 = arith.constant 0.000000e+00 : f32
      %160 = vector.broadcast %cst_100 : f32 to vector<4x8x1xf32>
      %c0_101 = arith.constant 0 : index
      %c0_102 = arith.constant 0 : index
      %c0_103 = arith.constant 0 : index
      %161 = vector.load %arg8[%c0_101, %c0_102, %c0_103] : memref<4x8x1xf32, #tpu.memory_space<vmem>>, vector<4x8x1xf32>
      tpu.vector_store %arg8[%c0_101, %c0_102, %c0_103], %160 {strides = array<i32>} : memref<4x8x1xf32, #tpu.memory_space<vmem>>, vector<4x8x1xf32>,
      %cst_104 = arith.constant 0.000000e+00 : f32
      %162 = vector.broadcast %cst_104 : f32 to vector<4x8x64xf32>
      %c0_105 = arith.constant 0 : index
      %c0_106 = arith.constant 0 : index
      %c0_107 = arith.constant 0 : index
      %163 = vector.load %arg9[%c0_105, %c0_106, %c0_107] : memref<4x8x64xf32, #tpu.memory_space<vmem>>, vector<4x8x64xf32>
      tpu.vector_store %arg9[%c0_105, %c0_106, %c0_107], %162 {strides = array<i32>} : memref<4x8x64xf32, #tpu.memory_space<vmem>>, vector<4x8x64xf32>,
    } else {
    }
    %c0 = arith.constant 0 : index
    %c0_1 = arith.constant 0 : index
    %c0_2 = arith.constant 0 : index
    %3 = vector.load %arg3[%c0, %c0_1, %c0_2] : memref<1x8x256xf32, #tpu.memory_space<vmem>>, vector<1x8x256xf32>
    %4 = vector.shape_cast %3 : vector<1x8x256xf32> to vector<8x256xf32>
    %cst = arith.constant 1.250000e-01 : f32
    %5 = vector.broadcast %cst : f32 to vector<8x256xf32>
    %6 = arith.mulf %4, %5 : vector<8x256xf32>
    %c0_3 = arith.constant 0 : index
    %c0_4 = arith.constant 0 : index
    %c0_5 = arith.constant 0 : index
    %7 = vector.load %arg4[%c0_3, %c0_4, %c0_5] : memref<1x8x256xf32, #tpu.memory_space<vmem>>, vector<1x8x256xf32>
    %8 = vector.shape_cast %7 : vector<1x8x256xf32> to vector<8x256xf32>
    %c0_6 = arith.constant 0 : index
    %c0_7 = arith.constant 0 : index
    %c0_8 = arith.constant 0 : index
    %9 = vector.load %arg5[%c0_6, %c0_7, %c0_8] : memref<1x8x256xf32, #tpu.memory_space<vmem>>, vector<1x8x256xf32>
    %10 = vector.shape_cast %9 : vector<1x8x256xf32> to vector<8x256xf32>
    %11 = vector.extract_strided_slice %6 {offsets = [0, 0], sizes = [8, 64], strides = [1, 1]} : vector<8x256xf32> to vector<8x64xf32>
    %12 = vector.extract_strided_slice %8 {offsets = [0, 0], sizes = [8, 64], strides = [1, 1]} : vector<8x256xf32> to vector<8x64xf32>
    %13 = vector.extract_strided_slice %10 {offsets = [0, 0], sizes = [8, 64], strides = [1, 1]} : vector<8x256xf32> to vector<8x64xf32>
    %14 = tpu.transpose %12, [1, 0] : vector<8x64xf32> -> vector<64x8xf32>
    %cst_9 = arith.constant dense<0.000000e+00> : vector<8x8xf32>
    %15 = tpu.matmul %11, %14, %cst_9 {dimension_numbers = #tpu.dot_dimension_numbers<[1], [0], [0], [1], [0, 0, 1, 1], [], []>} : vector<8x64xf32>, vector<64x8xf32>, vector<8x8xf32> -> vector<8x8xf32>
    %c0_10 = arith.constant 0 : index
    %c0_11 = arith.constant 0 : index
    %c0_12 = arith.constant 0 : index
    %16 = vector.load %arg7[%c0_10, %c0_11, %c0_12] : memref<4x8x1xf32, #tpu.memory_space<vmem>>, vector<1x8x1xf32>
    %17 = vector.shape_cast %16 : vector<1x8x1xf32> to vector<8x1xf32>
    %cst_13 = arith.constant dense<0xFF800000> : vector<8xf32>
    %18 = vector.multi_reduction <maximumf>, %15, %cst_13 [1] : vector<8x8xf32> to vector<8xf32>
    %19 = vector.shape_cast %18 : vector<8xf32> to vector<8x1xf32>
    %20 = arith.maximumf %17, %19 : vector<8x1xf32>
    %21 = arith.subf %17, %20 : vector<8x1xf32>
    %22 = math.exp %21 : vector<8x1xf32>
    %23 = vector.broadcast %20 : vector<8x1xf32> to vector<8x8xf32>
    %24 = arith.subf %15, %23 : vector<8x8xf32>
    %25 = math.exp %24 : vector<8x8xf32>
    %c0_14 = arith.constant 0 : index
    %c0_15 = arith.constant 0 : index
    %c0_16 = arith.constant 0 : index
    %26 = vector.load %arg8[%c0_14, %c0_15, %c0_16] : memref<4x8x1xf32, #tpu.memory_space<vmem>>, vector<1x8x1xf32>
    %27 = vector.shape_cast %26 : vector<1x8x1xf32> to vector<8x1xf32>
    %28 = arith.mulf %22, %27 : vector<8x1xf32>
    %cst_17 = arith.constant dense<0.000000e+00> : vector<8xf32>
    %29 = vector.multi_reduction <add>, %25, %cst_17 [1] : vector<8x8xf32> to vector<8xf32>
    %30 = vector.shape_cast %29 : vector<8xf32> to vector<8x1xf32>
    %31 = arith.addf %28, %30 : vector<8x1xf32>
    %c0_18 = arith.constant 0 : index
    %c0_19 = arith.constant 0 : index
    %c0_20 = arith.constant 0 : index
    %32 = vector.load %arg8[%c0_18, %c0_19, %c0_20] : memref<4x8x1xf32, #tpu.memory_space<vmem>>, vector<1x8x1xf32>
    %33 = vector.shape_cast %32 : vector<1x8x1xf32> to vector<8x1xf32>
    %34 = vector.shape_cast %31 : vector<8x1xf32> to vector<1x8x1xf32>
    tpu.vector_store %arg8[%c0_18, %c0_19, %c0_20], %34 {strides = array<i32>} : memref<4x8x1xf32, #tpu.memory_space<vmem>>, vector<1x8x1xf32>,
    %c0_21 = arith.constant 0 : index
    %c0_22 = arith.constant 0 : index
    %c0_23 = arith.constant 0 : index
    %35 = vector.load %arg9[%c0_21, %c0_22, %c0_23] : memref<4x8x64xf32, #tpu.memory_space<vmem>>, vector<1x8x64xf32>
    %36 = vector.shape_cast %35 : vector<1x8x64xf32> to vector<8x64xf32>
    %37 = vector.broadcast %22 : vector<8x1xf32> to vector<8x64xf32>
    %38 = arith.mulf %37, %36 : vector<8x64xf32>
    %cst_24 = arith.constant dense<0.000000e+00> : vector<8x64xf32>
    %39 = tpu.matmul %25, %13, %cst_24 {dimension_numbers = #tpu.dot_dimension_numbers<[1], [0], [0], [1], [0, 0, 1, 1], [], []>} : vector<8x8xf32>, vector<8x64xf32>, vector<8x64xf32> -> vector<8x64xf32>
    %40 = arith.addf %38, %39 : vector<8x64xf32>
    %c0_25 = arith.constant 0 : index
    %c0_26 = arith.constant 0 : index
    %c0_27 = arith.constant 0 : index
    %41 = vector.load %arg9[%c0_25, %c0_26, %c0_27] : memref<4x8x64xf32, #tpu.memory_space<vmem>>, vector<1x8x64xf32>
    %42 = vector.shape_cast %41 : vector<1x8x64xf32> to vector<8x64xf32>
    %43 = vector.shape_cast %40 : vector<8x64xf32> to vector<1x8x64xf32>
    tpu.vector_store %arg9[%c0_25, %c0_26, %c0_27], %43 {strides = array<i32>} : memref<4x8x64xf32, #tpu.memory_space<vmem>>, vector<1x8x64xf32>,
    %c0_28 = arith.constant 0 : index
    %c0_29 = arith.constant 0 : index
    %c0_30 = arith.constant 0 : index
    %44 = vector.load %arg7[%c0_28, %c0_29, %c0_30] : memref<4x8x1xf32, #tpu.memory_space<vmem>>, vector<1x8x1xf32>
    %45 = vector.shape_cast %44 : vector<1x8x1xf32> to vector<8x1xf32>
    %46 = vector.shape_cast %20 : vector<8x1xf32> to vector<1x8x1xf32>
    tpu.vector_store %arg7[%c0_28, %c0_29, %c0_30], %46 {strides = array<i32>} : memref<4x8x1xf32, #tpu.memory_space<vmem>>, vector<1x8x1xf32>,
    %47 = vector.extract_strided_slice %6 {offsets = [0, 64], sizes = [8, 64], strides = [1, 1]} : vector<8x256xf32> to vector<8x64xf32>
    %48 = vector.extract_strided_slice %8 {offsets = [0, 64], sizes = [8, 64], strides = [1, 1]} : vector<8x256xf32> to vector<8x64xf32>
    %49 = vector.extract_strided_slice %10 {offsets = [0, 64], sizes = [8, 64], strides = [1, 1]} : vector<8x256xf32> to vector<8x64xf32>
    %50 = tpu.transpose %48, [1, 0] : vector<8x64xf32> -> vector<64x8xf32>
    %cst_31 = arith.constant dense<0.000000e+00> : vector<8x8xf32>
    %51 = tpu.matmul %47, %50, %cst_31 {dimension_numbers = #tpu.dot_dimension_numbers<[1], [0], [0], [1], [0, 0, 1, 1], [], []>} : vector<8x64xf32>, vector<64x8xf32>, vector<8x8xf32> -> vector<8x8xf32>
    %c1 = arith.constant 1 : index
    %c0_32 = arith.constant 0 : index
    %c0_33 = arith.constant 0 : index
    %52 = vector.load %arg7[%c1, %c0_32, %c0_33] : memref<4x8x1xf32, #tpu.memory_space<vmem>>, vector<1x8x1xf32>
    %53 = vector.shape_cast %52 : vector<1x8x1xf32> to vector<8x1xf32>
    %cst_34 = arith.constant dense<0xFF800000> : vector<8xf32>
    %54 = vector.multi_reduction <maximumf>, %51, %cst_34 [1] : vector<8x8xf32> to vector<8xf32>
    %55 = vector.shape_cast %54 : vector<8xf32> to vector<8x1xf32>
    %56 = arith.maximumf %53, %55 : vector<8x1xf32>
    %57 = arith.subf %53, %56 : vector<8x1xf32>
    %58 = math.exp %57 : vector<8x1xf32>
    %59 = vector.broadcast %56 : vector<8x1xf32> to vector<8x8xf32>
    %60 = arith.subf %51, %59 : vector<8x8xf32>
    %61 = math.exp %60 : vector<8x8xf32>
    %c1_35 = arith.constant 1 : index
    %c0_36 = arith.constant 0 : index
    %c0_37 = arith.constant 0 : index
    %62 = vector.load %arg8[%c1_35, %c0_36, %c0_37] : memref<4x8x1xf32, #tpu.memory_space<vmem>>, vector<1x8x1xf32>
    %63 = vector.shape_cast %62 : vector<1x8x1xf32> to vector<8x1xf32>
    %64 = arith.mulf %58, %63 : vector<8x1xf32>
    %cst_38 = arith.constant dense<0.000000e+00> : vector<8xf32>
    %65 = vector.multi_reduction <add>, %61, %cst_38 [1] : vector<8x8xf32> to vector<8xf32>
    %66 = vector.shape_cast %65 : vector<8xf32> to vector<8x1xf32>
    %67 = arith.addf %64, %66 : vector<8x1xf32>
    %c1_39 = arith.constant 1 : index
    %c0_40 = arith.constant 0 : index
    %c0_41 = arith.constant 0 : index
    %68 = vector.load %arg8[%c1_39, %c0_40, %c0_41] : memref<4x8x1xf32, #tpu.memory_space<vmem>>, vector<1x8x1xf32>
    %69 = vector.shape_cast %68 : vector<1x8x1xf32> to vector<8x1xf32>
    %70 = vector.shape_cast %67 : vector<8x1xf32> to vector<1x8x1xf32>
    tpu.vector_store %arg8[%c1_39, %c0_40, %c0_41], %70 {strides = array<i32>} : memref<4x8x1xf32, #tpu.memory_space<vmem>>, vector<1x8x1xf32>,
    %c1_42 = arith.constant 1 : index
    %c0_43 = arith.constant 0 : index
    %c0_44 = arith.constant 0 : index
    %71 = vector.load %arg9[%c1_42, %c0_43, %c0_44] : memref<4x8x64xf32, #tpu.memory_space<vmem>>, vector<1x8x64xf32>
    %72 = vector.shape_cast %71 : vector<1x8x64xf32> to vector<8x64xf32>
    %73 = vector.broadcast %58 : vector<8x1xf32> to vector<8x64xf32>
    %74 = arith.mulf %73, %72 : vector<8x64xf32>
    %cst_45 = arith.constant dense<0.000000e+00> : vector<8x64xf32>
    %75 = tpu.matmul %61, %49, %cst_45 {dimension_numbers = #tpu.dot_dimension_numbers<[1], [0], [0], [1], [0, 0, 1, 1], [], []>} : vector<8x8xf32>, vector<8x64xf32>, vector<8x64xf32> -> vector<8x64xf32>
    %76 = arith.addf %74, %75 : vector<8x64xf32>
    %c1_46 = arith.constant 1 : index
    %c0_47 = arith.constant 0 : index
    %c0_48 = arith.constant 0 : index
    %77 = vector.load %arg9[%c1_46, %c0_47, %c0_48] : memref<4x8x64xf32, #tpu.memory_space<vmem>>, vector<1x8x64xf32>
    %78 = vector.shape_cast %77 : vector<1x8x64xf32> to vector<8x64xf32>
    %79 = vector.shape_cast %76 : vector<8x64xf32> to vector<1x8x64xf32>
    tpu.vector_store %arg9[%c1_46, %c0_47, %c0_48], %79 {strides = array<i32>} : memref<4x8x64xf32, #tpu.memory_space<vmem>>, vector<1x8x64xf32>,
    %c1_49 = arith.constant 1 : index
    %c0_50 = arith.constant 0 : index
    %c0_51 = arith.constant 0 : index
    %80 = vector.load %arg7[%c1_49, %c0_50, %c0_51] : memref<4x8x1xf32, #tpu.memory_space<vmem>>, vector<1x8x1xf32>
    %81 = vector.shape_cast %80 : vector<1x8x1xf32> to vector<8x1xf32>
    %82 = vector.shape_cast %56 : vector<8x1xf32> to vector<1x8x1xf32>
    tpu.vector_store %arg7[%c1_49, %c0_50, %c0_51], %82 {strides = array<i32>} : memref<4x8x1xf32, #tpu.memory_space<vmem>>, vector<1x8x1xf32>,
    %83 = vector.extract_strided_slice %6 {offsets = [0, 128], sizes = [8, 64], strides = [1, 1]} : vector<8x256xf32> to vector<8x64xf32>
    %84 = vector.extract_strided_slice %8 {offsets = [0, 128], sizes = [8, 64], strides = [1, 1]} : vector<8x256xf32> to vector<8x64xf32>
    %85 = vector.extract_strided_slice %10 {offsets = [0, 128], sizes = [8, 64], strides = [1, 1]} : vector<8x256xf32> to vector<8x64xf32>
    %86 = tpu.transpose %84, [1, 0] : vector<8x64xf32> -> vector<64x8xf32>
    %cst_52 = arith.constant dense<0.000000e+00> : vector<8x8xf32>
    %87 = tpu.matmul %83, %86, %cst_52 {dimension_numbers = #tpu.dot_dimension_numbers<[1], [0], [0], [1], [0, 0, 1, 1], [], []>} : vector<8x64xf32>, vector<64x8xf32>, vector<8x8xf32> -> vector<8x8xf32>
    %c2 = arith.constant 2 : index
    %c0_53 = arith.constant 0 : index
    %c0_54 = arith.constant 0 : index
    %88 = vector.load %arg7[%c2, %c0_53, %c0_54] : memref<4x8x1xf32, #tpu.memory_space<vmem>>, vector<1x8x1xf32>
    %89 = vector.shape_cast %88 : vector<1x8x1xf32> to vector<8x1xf32>
    %cst_55 = arith.constant dense<0xFF800000> : vector<8xf32>
    %90 = vector.multi_reduction <maximumf>, %87, %cst_55 [1] : vector<8x8xf32> to vector<8xf32>
    %91 = vector.shape_cast %90 : vector<8xf32> to vector<8x1xf32>
    %92 = arith.maximumf %89, %91 : vector<8x1xf32>
    %93 = arith.subf %89, %92 : vector<8x1xf32>
    %94 = math.exp %93 : vector<8x1xf32>
    %95 = vector.broadcast %92 : vector<8x1xf32> to vector<8x8xf32>
    %96 = arith.subf %87, %95 : vector<8x8xf32>
    %97 = math.exp %96 : vector<8x8xf32>
    %c2_56 = arith.constant 2 : index
    %c0_57 = arith.constant 0 : index
    %c0_58 = arith.constant 0 : index
    %98 = vector.load %arg8[%c2_56, %c0_57, %c0_58] : memref<4x8x1xf32, #tpu.memory_space<vmem>>, vector<1x8x1xf32>
    %99 = vector.shape_cast %98 : vector<1x8x1xf32> to vector<8x1xf32>
    %100 = arith.mulf %94, %99 : vector<8x1xf32>
    %cst_59 = arith.constant dense<0.000000e+00> : vector<8xf32>
    %101 = vector.multi_reduction <add>, %97, %cst_59 [1] : vector<8x8xf32> to vector<8xf32>
    %102 = vector.shape_cast %101 : vector<8xf32> to vector<8x1xf32>
    %103 = arith.addf %100, %102 : vector<8x1xf32>
    %c2_60 = arith.constant 2 : index
    %c0_61 = arith.constant 0 : index
    %c0_62 = arith.constant 0 : index
    %104 = vector.load %arg8[%c2_60, %c0_61, %c0_62] : memref<4x8x1xf32, #tpu.memory_space<vmem>>, vector<1x8x1xf32>
    %105 = vector.shape_cast %104 : vector<1x8x1xf32> to vector<8x1xf32>
    %106 = vector.shape_cast %103 : vector<8x1xf32> to vector<1x8x1xf32>
    tpu.vector_store %arg8[%c2_60, %c0_61, %c0_62], %106 {strides = array<i32>} : memref<4x8x1xf32, #tpu.memory_space<vmem>>, vector<1x8x1xf32>,
    %c2_63 = arith.constant 2 : index
    %c0_64 = arith.constant 0 : index
    %c0_65 = arith.constant 0 : index
    %107 = vector.load %arg9[%c2_63, %c0_64, %c0_65] : memref<4x8x64xf32, #tpu.memory_space<vmem>>, vector<1x8x64xf32>
    %108 = vector.shape_cast %107 : vector<1x8x64xf32> to vector<8x64xf32>
    %109 = vector.broadcast %94 : vector<8x1xf32> to vector<8x64xf32>
    %110 = arith.mulf %109, %108 : vector<8x64xf32>
    %cst_66 = arith.constant dense<0.000000e+00> : vector<8x64xf32>
    %111 = tpu.matmul %97, %85, %cst_66 {dimension_numbers = #tpu.dot_dimension_numbers<[1], [0], [0], [1], [0, 0, 1, 1], [], []>} : vector<8x8xf32>, vector<8x64xf32>, vector<8x64xf32> -> vector<8x64xf32>
    %112 = arith.addf %110, %111 : vector<8x64xf32>
    %c2_67 = arith.constant 2 : index
    %c0_68 = arith.constant 0 : index
    %c0_69 = arith.constant 0 : index
    %113 = vector.load %arg9[%c2_67, %c0_68, %c0_69] : memref<4x8x64xf32, #tpu.memory_space<vmem>>, vector<1x8x64xf32>
    %114 = vector.shape_cast %113 : vector<1x8x64xf32> to vector<8x64xf32>
    %115 = vector.shape_cast %112 : vector<8x64xf32> to vector<1x8x64xf32>
    tpu.vector_store %arg9[%c2_67, %c0_68, %c0_69], %115 {strides = array<i32>} : memref<4x8x64xf32, #tpu.memory_space<vmem>>, vector<1x8x64xf32>,
    %c2_70 = arith.constant 2 : index
    %c0_71 = arith.constant 0 : index
    %c0_72 = arith.constant 0 : index
    %116 = vector.load %arg7[%c2_70, %c0_71, %c0_72] : memref<4x8x1xf32, #tpu.memory_space<vmem>>, vector<1x8x1xf32>
    %117 = vector.shape_cast %116 : vector<1x8x1xf32> to vector<8x1xf32>
    %118 = vector.shape_cast %92 : vector<8x1xf32> to vector<1x8x1xf32>
    tpu.vector_store %arg7[%c2_70, %c0_71, %c0_72], %118 {strides = array<i32>} : memref<4x8x1xf32, #tpu.memory_space<vmem>>, vector<1x8x1xf32>,
    %119 = vector.extract_strided_slice %6 {offsets = [0, 192], sizes = [8, 64], strides = [1, 1]} : vector<8x256xf32> to vector<8x64xf32>
    %120 = vector.extract_strided_slice %8 {offsets = [0, 192], sizes = [8, 64], strides = [1, 1]} : vector<8x256xf32> to vector<8x64xf32>
    %121 = vector.extract_strided_slice %10 {offsets = [0, 192], sizes = [8, 64], strides = [1, 1]} : vector<8x256xf32> to vector<8x64xf32>
    %122 = tpu.transpose %120, [1, 0] : vector<8x64xf32> -> vector<64x8xf32>
    %cst_73 = arith.constant dense<0.000000e+00> : vector<8x8xf32>
    %123 = tpu.matmul %119, %122, %cst_73 {dimension_numbers = #tpu.dot_dimension_numbers<[1], [0], [0], [1], [0, 0, 1, 1], [], []>} : vector<8x64xf32>, vector<64x8xf32>, vector<8x8xf32> -> vector<8x8xf32>
    %c3 = arith.constant 3 : index
    %c0_74 = arith.constant 0 : index
    %c0_75 = arith.constant 0 : index
    %124 = vector.load %arg7[%c3, %c0_74, %c0_75] : memref<4x8x1xf32, #tpu.memory_space<vmem>>, vector<1x8x1xf32>
    %125 = vector.shape_cast %124 : vector<1x8x1xf32> to vector<8x1xf32>
    %cst_76 = arith.constant dense<0xFF800000> : vector<8xf32>
    %126 = vector.multi_reduction <maximumf>, %123, %cst_76 [1] : vector<8x8xf32> to vector<8xf32>
    %127 = vector.shape_cast %126 : vector<8xf32> to vector<8x1xf32>
    %128 = arith.maximumf %125, %127 : vector<8x1xf32>
    %129 = arith.subf %125, %128 : vector<8x1xf32>
    %130 = math.exp %129 : vector<8x1xf32>
    %131 = vector.broadcast %128 : vector<8x1xf32> to vector<8x8xf32>
    %132 = arith.subf %123, %131 : vector<8x8xf32>
    %133 = math.exp %132 : vector<8x8xf32>
    %c3_77 = arith.constant 3 : index
    %c0_78 = arith.constant 0 : index
    %c0_79 = arith.constant 0 : index
    %134 = vector.load %arg8[%c3_77, %c0_78, %c0_79] : memref<4x8x1xf32, #tpu.memory_space<vmem>>, vector<1x8x1xf32>
    %135 = vector.shape_cast %134 : vector<1x8x1xf32> to vector<8x1xf32>
    %136 = arith.mulf %130, %135 : vector<8x1xf32>
    %cst_80 = arith.constant dense<0.000000e+00> : vector<8xf32>
    %137 = vector.multi_reduction <add>, %133, %cst_80 [1] : vector<8x8xf32> to vector<8xf32>
    %138 = vector.shape_cast %137 : vector<8xf32> to vector<8x1xf32>
    %139 = arith.addf %136, %138 : vector<8x1xf32>
    %c3_81 = arith.constant 3 : index
    %c0_82 = arith.constant 0 : index
    %c0_83 = arith.constant 0 : index
    %140 = vector.load %arg8[%c3_81, %c0_82, %c0_83] : memref<4x8x1xf32, #tpu.memory_space<vmem>>, vector<1x8x1xf32>
    %141 = vector.shape_cast %140 : vector<1x8x1xf32> to vector<8x1xf32>
    %142 = vector.shape_cast %139 : vector<8x1xf32> to vector<1x8x1xf32>
    tpu.vector_store %arg8[%c3_81, %c0_82, %c0_83], %142 {strides = array<i32>} : memref<4x8x1xf32, #tpu.memory_space<vmem>>, vector<1x8x1xf32>,
    %c3_84 = arith.constant 3 : index
    %c0_85 = arith.constant 0 : index
    %c0_86 = arith.constant 0 : index
    %143 = vector.load %arg9[%c3_84, %c0_85, %c0_86] : memref<4x8x64xf32, #tpu.memory_space<vmem>>, vector<1x8x64xf32>
    %144 = vector.shape_cast %143 : vector<1x8x64xf32> to vector<8x64xf32>
    %145 = vector.broadcast %130 : vector<8x1xf32> to vector<8x64xf32>
    %146 = arith.mulf %145, %144 : vector<8x64xf32>
    %cst_87 = arith.constant dense<0.000000e+00> : vector<8x64xf32>
    %147 = tpu.matmul %133, %121, %cst_87 {dimension_numbers = #tpu.dot_dimension_numbers<[1], [0], [0], [1], [0, 0, 1, 1], [], []>} : vector<8x8xf32>, vector<8x64xf32>, vector<8x64xf32> -> vector<8x64xf32>
    %148 = arith.addf %146, %147 : vector<8x64xf32>
    %c3_88 = arith.constant 3 : index
    %c0_89 = arith.constant 0 : index
    %c0_90 = arith.constant 0 : index
    %149 = vector.load %arg9[%c3_88, %c0_89, %c0_90] : memref<4x8x64xf32, #tpu.memory_space<vmem>>, vector<1x8x64xf32>
    %150 = vector.shape_cast %149 : vector<1x8x64xf32> to vector<8x64xf32>
    %151 = vector.shape_cast %148 : vector<8x64xf32> to vector<1x8x64xf32>
    tpu.vector_store %arg9[%c3_88, %c0_89, %c0_90], %151 {strides = array<i32>} : memref<4x8x64xf32, #tpu.memory_space<vmem>>, vector<1x8x64xf32>,
    %c3_91 = arith.constant 3 : index
    %c0_92 = arith.constant 0 : index
    %c0_93 = arith.constant 0 : index
    %152 = vector.load %arg7[%c3_91, %c0_92, %c0_93] : memref<4x8x1xf32, #tpu.memory_space<vmem>>, vector<1x8x1xf32>
    %153 = vector.shape_cast %152 : vector<1x8x1xf32> to vector<8x1xf32>
    %154 = vector.shape_cast %128 : vector<8x1xf32> to vector<1x8x1xf32>
    tpu.vector_store %arg7[%c3_91, %c0_92, %c0_93], %154 {strides = array<i32>} : memref<4x8x1xf32, #tpu.memory_space<vmem>>, vector<1x8x1xf32>,
    %c0_i32_94 = arith.constant 0 : i32
    %155 = arith.cmpi eq, %arg2, %c0_i32_94 : i32
    %156 = arith.extui %155 : i1 to i32
    %c0_i32_95 = arith.constant 0 : i32
    %157 = arith.cmpi ne, %156, %c0_i32_95 : i32
    scf.if %157 {
      %c0_96 = arith.constant 0 : index
      %c0_97 = arith.constant 0 : index
      %c0_98 = arith.constant 0 : index
      %158 = vector.load %arg9[%c0_96, %c0_97, %c0_98] : memref<4x8x64xf32, #tpu.memory_space<vmem>>, vector<1x8x64xf32>
      %159 = vector.shape_cast %158 : vector<1x8x64xf32> to vector<8x64xf32>
      %c0_99 = arith.constant 0 : index
      %c0_100 = arith.constant 0 : index
      %c0_101 = arith.constant 0 : index
      %160 = vector.load %arg8[%c0_99, %c0_100, %c0_101] : memref<4x8x1xf32, #tpu.memory_space<vmem>>, vector<1x8x1xf32>
      %161 = vector.shape_cast %160 : vector<1x8x1xf32> to vector<8x1xf32>
      %162 = tpu.reciprocal %161 {approx = true} : vector<8x1xf32> -> vector<8x1xf32>
      %163 = vector.broadcast %162 : vector<8x1xf32> to vector<8x64xf32>
      %164 = arith.mulf %159, %163 : vector<8x64xf32>
      %c1_102 = arith.constant 1 : index
      %c0_103 = arith.constant 0 : index
      %c0_104 = arith.constant 0 : index
      %165 = vector.load %arg9[%c1_102, %c0_103, %c0_104] : memref<4x8x64xf32, #tpu.memory_space<vmem>>, vector<1x8x64xf32>
      %166 = vector.shape_cast %165 : vector<1x8x64xf32> to vector<8x64xf32>
      %c1_105 = arith.constant 1 : index
      %c0_106 = arith.constant 0 : index
      %c0_107 = arith.constant 0 : index
      %167 = vector.load %arg8[%c1_105, %c0_106, %c0_107] : memref<4x8x1xf32, #tpu.memory_space<vmem>>, vector<1x8x1xf32>
      %168 = vector.shape_cast %167 : vector<1x8x1xf32> to vector<8x1xf32>
      %169 = tpu.reciprocal %168 {approx = true} : vector<8x1xf32> -> vector<8x1xf32>
      %170 = vector.broadcast %169 : vector<8x1xf32> to vector<8x64xf32>
      %171 = arith.mulf %166, %170 : vector<8x64xf32>
      %c2_108 = arith.constant 2 : index
      %c0_109 = arith.constant 0 : index
      %c0_110 = arith.constant 0 : index
      %172 = vector.load %arg9[%c2_108, %c0_109, %c0_110] : memref<4x8x64xf32, #tpu.memory_space<vmem>>, vector<1x8x64xf32>
      %173 = vector.shape_cast %172 : vector<1x8x64xf32> to vector<8x64xf32>
      %c2_111 = arith.constant 2 : index
      %c0_112 = arith.constant 0 : index
      %c0_113 = arith.constant 0 : index
      %174 = vector.load %arg8[%c2_111, %c0_112, %c0_113] : memref<4x8x1xf32, #tpu.memory_space<vmem>>, vector<1x8x1xf32>
      %175 = vector.shape_cast %174 : vector<1x8x1xf32> to vector<8x1xf32>
      %176 = tpu.reciprocal %175 {approx = true} : vector<8x1xf32> -> vector<8x1xf32>
      %177 = vector.broadcast %176 : vector<8x1xf32> to vector<8x64xf32>
      %178 = arith.mulf %173, %177 : vector<8x64xf32>
      %c3_114 = arith.constant 3 : index
      %c0_115 = arith.constant 0 : index
      %c0_116 = arith.constant 0 : index
      %179 = vector.load %arg9[%c3_114, %c0_115, %c0_116] : memref<4x8x64xf32, #tpu.memory_space<vmem>>, vector<1x8x64xf32>
      %180 = vector.shape_cast %179 : vector<1x8x64xf32> to vector<8x64xf32>
      %c3_117 = arith.constant 3 : index
      %c0_118 = arith.constant 0 : index
      %c0_119 = arith.constant 0 : index
      %181 = vector.load %arg8[%c3_117, %c0_118, %c0_119] : memref<4x8x1xf32, #tpu.memory_space<vmem>>, vector<1x8x1xf32>
      %182 = vector.shape_cast %181 : vector<1x8x1xf32> to vector<8x1xf32>
      %183 = tpu.reciprocal %182 {approx = true} : vector<8x1xf32> -> vector<8x1xf32>
      %184 = vector.broadcast %183 : vector<8x1xf32> to vector<8x64xf32>
      %185 = arith.mulf %180, %184 : vector<8x64xf32>
      %186 = tpu.concatenate %164, %171, %178, %185 in 1 : vector<8x64xf32>, vector<8x64xf32>, vector<8x64xf32>, vector<8x64xf32> -> vector<8x256xf32>
      %c0_120 = arith.constant 0 : index
      %c0_121 = arith.constant 0 : index
      %c0_122 = arith.constant 0 : index
      %187 = vector.load %arg6[%c0_120, %c0_121, %c0_122] : memref<1x8x256xf32, #tpu.memory_space<vmem>>, vector<1x8x256xf32>
      %188 = vector.shape_cast %187 : vector<1x8x256xf32> to vector<8x256xf32>
      %189 = vector.shape_cast %186 : vector<8x256xf32> to vector<1x8x256xf32>
      tpu.vector_store %arg6[%c0_120, %c0_121, %c0_122], %189 {strides = array<i32>} : memref<1x8x256xf32, #tpu.memory_space<vmem>>, vector<1x8x256xf32>,
    } else {
    }
    return
  }
  func.func @transform_0(%arg0: i32, %arg1: i32, %arg2: i32) -> (i32, i32, i32) {
    %c0_i32 = arith.constant 0 : i32
    %c0_i32_0 = arith.constant 0 : i32
    return %arg0, %arg1, %c0_i32 : i32, i32, i32
  }
  func.func @transform_1(%arg0: i32, %arg1: i32, %arg2: i32) -> (i32, i32, i32) {
    %c1_i32 = arith.constant 1 : i32
    %c0_i32 = arith.constant 0 : i32
    return %arg0, %arg2, %c1_i32 : i32, i32, i32
  }
  func.func @transform_2(%arg0: i32, %arg1: i32, %arg2: i32) -> (i32, i32, i32) {
    %c2_i32 = arith.constant 2 : i32
    %c0_i32 = arith.constant 0 : i32
    return %arg0, %arg2, %c2_i32 : i32, i32, i32
  }
  func.func @transform_3(%arg0: i32, %arg1: i32, %arg2: i32) -> (i32, i32, i32) {
    %c0_i32 = arith.constant 0 : i32
    %c0_i32_0 = arith.constant 0 : i32
    return %arg0, %arg1, %c0_i32 : i32, i32, i32
  }
}

module attributes {stable_mosaic.version = 11 : i64} {
  func.func @_matmul_bias_kernel(%arg0: i32, %arg1: i32, %arg2: i32, %arg3: memref<16x256xf32, #tpu.memory_space<vmem>>, %arg4: memref<256x128xf32, #tpu.memory_space<vmem>>, %arg5: memref<1x128xf32, #tpu.memory_space<vmem>>, %arg6: memref<16x128xf32, #tpu.memory_space<vmem>>, %arg7: memref<16x128xf32, #tpu.memory_space<vmem>>) attributes {dimension_semantics = [#tpu.dimension_semantics<parallel>, #tpu.dimension_semantics<parallel>, #tpu.dimension_semantics<arbitrary>], iteration_bounds = array<i64: 1, 1, 1>, scalar_prefetch = 0 : i64, scratch_operands = 1 : i64, tpu.core_type = #tpu.core_type<tc>, window_params = [{transform_indices = @transform_0, window_bounds = array<i64: 16, 256>}, {transform_indices = @transform_1, window_bounds = array<i64: 256, 128>}, {transform_indices = @transform_2, window_bounds = array<i64: 1, 128>}, {transform_indices = @transform_3, window_bounds = array<i64: 16, 128>}]} {
    %c0_i32 = arith.constant 0 : i32
    %0 = arith.cmpi eq, %arg2, %c0_i32 : i32
    %1 = arith.extui %0 : i1 to i32
    %c0_i32_0 = arith.constant 0 : i32
    %2 = arith.cmpi ne, %1, %c0_i32_0 : i32
    scf.if %2 {
      %cst_10 = arith.constant 0.000000e+00 : f32
      %12 = vector.broadcast %cst_10 : f32 to vector<16x128xf32>
      %c0_11 = arith.constant 0 : index
      %c0_12 = arith.constant 0 : index
      %13 = vector.load %arg7[%c0_11, %c0_12] : memref<16x128xf32, #tpu.memory_space<vmem>>, vector<16x128xf32>
      tpu.vector_store %arg7[%c0_11, %c0_12], %12 {strides = array<i32>} : memref<16x128xf32, #tpu.memory_space<vmem>>, vector<16x128xf32>,
    } else {
    }
    %c0 = arith.constant 0 : index
    %c0_1 = arith.constant 0 : index
    %3 = vector.load %arg7[%c0, %c0_1] : memref<16x128xf32, #tpu.memory_space<vmem>>, vector<16x128xf32>
    %c0_2 = arith.constant 0 : index
    %c0_3 = arith.constant 0 : index
    %4 = vector.load %arg3[%c0_2, %c0_3] : memref<16x256xf32, #tpu.memory_space<vmem>>, vector<16x256xf32>
    %c0_4 = arith.constant 0 : index
    %c0_5 = arith.constant 0 : index
    %5 = vector.load %arg4[%c0_4, %c0_5] : memref<256x128xf32, #tpu.memory_space<vmem>>, vector<256x128xf32>
    %cst = arith.constant dense<0.000000e+00> : vector<16x128xf32>
    %6 = tpu.matmul %4, %5, %cst {dimension_numbers = #tpu.dot_dimension_numbers<[1], [0], [0], [1], [0, 0, 1, 1], [], []>} : vector<16x256xf32>, vector<256x128xf32>, vector<16x128xf32> -> vector<16x128xf32>
    %7 = arith.addf %3, %6 : vector<16x128xf32>
    %c0_6 = arith.constant 0 : index
    %c0_7 = arith.constant 0 : index
    %8 = vector.load %arg7[%c0_6, %c0_7] : memref<16x128xf32, #tpu.memory_space<vmem>>, vector<16x128xf32>
    tpu.vector_store %arg7[%c0_6, %c0_7], %7 {strides = array<i32>} : memref<16x128xf32, #tpu.memory_space<vmem>>, vector<16x128xf32>,
    %c0_i32_8 = arith.constant 0 : i32
    %9 = arith.cmpi eq, %arg2, %c0_i32_8 : i32
    %10 = arith.extui %9 : i1 to i32
    %c0_i32_9 = arith.constant 0 : i32
    %11 = arith.cmpi ne, %10, %c0_i32_9 : i32
    scf.if %11 {
      %c0_10 = arith.constant 0 : index
      %c0_11 = arith.constant 0 : index
      %12 = vector.load %arg7[%c0_10, %c0_11] : memref<16x128xf32, #tpu.memory_space<vmem>>, vector<16x128xf32>
      %c0_12 = arith.constant 0 : index
      %c0_13 = arith.constant 0 : index
      %13 = vector.load %arg5[%c0_12, %c0_13] : memref<1x128xf32, #tpu.memory_space<vmem>>, vector<1x128xf32>
      %14 = vector.broadcast %13 : vector<1x128xf32> to vector<16x128xf32>
      %15 = arith.addf %12, %14 : vector<16x128xf32>
      %c0_14 = arith.constant 0 : index
      %c0_15 = arith.constant 0 : index
      %16 = vector.load %arg6[%c0_14, %c0_15] : memref<16x128xf32, #tpu.memory_space<vmem>>, vector<16x128xf32>
      tpu.vector_store %arg6[%c0_14, %c0_15], %15 {strides = array<i32>} : memref<16x128xf32, #tpu.memory_space<vmem>>, vector<16x128xf32>,
    } else {
    }
    return
  }
  func.func @transform_0(%arg0: i32, %arg1: i32, %arg2: i32) -> (i32, i32) {
    %c0_i32 = arith.constant 0 : i32
    return %arg0, %arg2 : i32, i32
  }
  func.func @transform_1(%arg0: i32, %arg1: i32, %arg2: i32) -> (i32, i32) {
    %c0_i32 = arith.constant 0 : i32
    return %arg2, %arg1 : i32, i32
  }
  func.func @transform_2(%arg0: i32, %arg1: i32, %arg2: i32) -> (i32, i32) {
    %c0_i32 = arith.constant 0 : i32
    %c0_i32_0 = arith.constant 0 : i32
    return %c0_i32, %arg1 : i32, i32
  }
  func.func @transform_3(%arg0: i32, %arg1: i32, %arg2: i32) -> (i32, i32) {
    %c0_i32 = arith.constant 0 : i32
    return %arg0, %arg1 : i32, i32
  }
}

</mosaic_0001>

<bundles_post_ra>
// kernel: attention_forward.3
= control target key start
LH: loop header
LB: loop body
LE: loop exit
PB: predicated region body
PF: predicated region fallthrough
CT: control target
= control target key end

     0   :  { %s667_s9 = smov 0   ;;  %s669_s10 = smov 0   ;;  %s851_s0 = inlined_call_operand.vmem [shape: f32[16,128], index: 0, kind: input, shape index: {}]   ;;  %s852_s1 = inlined_call_operand.vmem [shape: f32[128,768], index: 1, kind: input, shape index: {}]   ;;  %s853_s2 = inlined_call_operand.vmem [shape: f32[16,768], index: 2, kind: output, shape index: {}]  }
   0x1   :  { %s671_s11 = smov 0   ;;  %s673_s12 = smov 0  }
   0x2   :  { %s675_s13 = smov 0  }
   0x3 LB: > { %s27_s14 = sadd.s32 1, %s646_s12  ;;  %s522_s15 = sadd.s32 4294967295, %s650_s13   ;;  %s650_s13 = sphi %s675_s13, %s12_s13   ;;  %s646_s12 = sphi %s673_s12, %s858_s12   ;;  %s642_s11 = sphi %s671_s11, %s857_s11   ;;  %s638_s10 = sphi %s669_s10, %s856_s10   ;;  %s634_s9 = sphi %s667_s9, %s855_s9  }
   0x4   : > { %p29_p0 = scmp.ge.s32.totalorder %s27_s14, 3  ;;  %p75_p1 = scmp.ne.s32.totalorder %s638_s10, %s634_s9 }
   0x5   : > { %p76_p2 = scmp.eq.s32.totalorder %s650_s13, 0  ;;  %p107_p4 = scmp.eq.s32.totalorder %s522_s15, 2 }
   0x6   : > { %s860_s14 = smov (%p29_p0, %s27_s14), 0  ;;  %s68_s17 = sadd.s32 1, %s638_s10 }
   0x7   : > { %p77_p3 = por %p76_p2, %p75_p1  ;;  %s64_s16 = ssub.s32 %s646_s12, %s860_s14 }
   0x8   : > { %p66_p5 = scmp.eq.s32.totalorder %s64_s16, 0  ;;  %p702_p6 = por %p107_p4, %p75_p1 }
   0x9   : > { %p526_p7 = scmp.ge.s32.totalorder %s650_s13, 3 }
   0xa   : > { %s707_s19 = scalar_select %p66_p5, %s638_s10, %s68_s17  }
   0xb   : > { %141 = sbr.rel (%p526_p7) target bundleno = 52 (0x34), region = 20 }
  0x10   : > { %144 = sbr.rel (!%p77_p3) target bundleno = 52 (0x34), region = 24  ;;  %s146_s20 = sand.u32 (%p77_p3), 1, %s638_s10  }
  0x11   : > { %s538_s21 = sshll.u32 (%p77_p3), %s646_s12, 4  ;;  %s527_s22 = sshll.u32 (%p77_p3), %s146_s20, 8 }
  0x12   : > { %s715_s25 = scalar_lea.vmem (%p77_p3), %s852_s1, %s538_s21  ;;  %s720_s26 = scalar_lea.vmem (%p77_p3), [#allocation3], %s527_s22 }
  0x13   : > { %v167_v0 = vld [vmem:[%s715_s25] sm:$0xff] (%p77_p3)  ;;  %v169_v1 = vld [vmem:[%s715_s25 + $0x8] sm:$0xff] (%p77_p3)  ;;  %v171_v2 = vld [vmem:[%s715_s25 + $0x30] sm:$0xff] (%p77_p3) }
  0x14   : > { %168 = vst [vmem:[%s720_s26] sm:$0xff] (%p77_p3), %v167_v0  ;;  %v173_v3 = vld [vmem:[%s715_s25 + $0x38] sm:$0xff] (%p77_p3)  ;;  %v175_v4 = vld [vmem:[%s715_s25 + $0x60] sm:$0xff] (%p77_p3)  ;;  %v177_v5 = vld [vmem:[%s715_s25 + $0x68] sm:$0xff] (%p77_p3) }
  0x15   : > { %170 = vst [vmem:[%s720_s26 + $0x8] sm:$0xff] %v169_v1  ;;  %v179_v6 = vld [vmem:[%s715_s25 + $0x90] sm:$0xff]  ;;  %v181_v7 = vld [vmem:[%s715_s25 + $0x98] sm:$0xff]  ;;  %v183_v8 = vld [vmem:[%s715_s25 + $0xc0] sm:$0xff] }
  0x16   : > { %172 = vst [vmem:[%s720_s26 + $0x10] sm:$0xff] %v171_v2  ;;  %v185_v9 = vld [vmem:[%s715_s25 + $0xc8] sm:$0xff]  ;;  %v187_v10 = vld [vmem:[%s715_s25 + $0xf0] sm:$0xff]  ;;  %v189_v11 = vld [vmem:[%s715_s25 + $0xf8] sm:$0xff] }
  0x17   : > { %174 = vst [vmem:[%s720_s26 + $0x18] sm:$0xff] %v173_v3  ;;  %v191_v12 = vld [vmem:[%s715_s25 + $0x120] sm:$0xff]  ;;  %v193_v13 = vld [vmem:[%s715_s25 + $0x128] sm:$0xff]  ;;  %v195_v14 = vld [vmem:[%s715_s25 + $0x150] sm:$0xff] }
  0x18   : > { %176 = vst [vmem:[%s720_s26 + $0x20] sm:$0xff] %v175_v4  ;;  %v197_v15 = vld [vmem:[%s715_s25 + $0x158] sm:$0xff]  ;;  %v199_v16 = vld [vmem:[%s715_s25 + $0x180] sm:$0xff]  ;;  %v201_v17 = vld [vmem:[%s715_s25 + $0x188] sm:$0xff] }
  0x19   : > { %178 = vst [vmem:[%s720_s26 + $0x28] sm:$0xff] %v177_v5  ;;  %v203_v18 = vld [vmem:[%s715_s25 + $0x1b0] sm:$0xff]  ;;  %v205_v19 = vld [vmem:[%s715_s25 + $0x1b8] sm:$0xff]  ;;  %v207_v20 = vld [vmem:[%s715_s25 + $0x1e0] sm:$0xff] }
  0x1a   : > { %180 = vst [vmem:[%s720_s26 + $0x30] sm:$0xff] %v179_v6  ;;  %v209_v21 = vld [vmem:[%s715_s25 + $0x1e8] sm:$0xff]  ;;  %v211_v22 = vld [vmem:[%s715_s25 + $0x210] sm:$0xff]  ;;  %v213_v23 = vld [vmem:[%s715_s25 + $0x218] sm:$0xff] }
  0x1b   : > { %182 = vst [vmem:[%s720_s26 + $0x38] sm:$0xff] %v181_v7  ;;  %v215_v24 = vld [vmem:[%s715_s25 + $0x240] sm:$0xff]  ;;  %v217_v25 = vld [vmem:[%s715_s25 + $0x248] sm:$0xff]  ;;  %v219_v26 = vld [vmem:[%s715_s25 + $0x270] sm:$0xff] }
  0x1c   : > { %184 = vst [vmem:[%s720_s26 + $0x40] sm:$0xff] %v183_v8  ;;  %v221_v27 = vld [vmem:[%s715_s25 + $0x278] sm:$0xff]  ;;  %v223_v28 = vld [vmem:[%s715_s25 + $0x2a0] sm:$0xff]  ;;  %v225_v29 = vld [vmem:[%s715_s25 + $0x2a8] sm:$0xff] }
  0x1d   : > { %186 = vst [vmem:[%s720_s26 + $0x48] sm:$0xff] %v185_v9  ;;  %v227_v30 = vld [vmem:[%s715_s25 + $0x2d0] sm:$0xff]  ;;  %v229_v31 = vld [vmem:[%s715_s25 + $0x2d8] sm:$0xff] }
  0x1e   : > { %188 = vst [vmem:[%s720_s26 + $0x50] sm:$0xff] %v187_v10 }
  0x1f   : > { %190 = vst [vmem:[%s720_s26 + $0x58] sm:$0xff] %v189_v11 }
  0x20   : > { %192 = vst [vmem:[%s720_s26 + $0x60] sm:$0xff] %v191_v12 }
  0x21   : > { %194 = vst [vmem:[%s720_s26 + $0x68] sm:$0xff] %v193_v13 }
  0x22   : > { %196 = vst [vmem:[%s720_s26 + $0x70] sm:$0xff] %v195_v14 }
  0x23   : > { %198 = vst [vmem:[%s720_s26 + $0x78] sm:$0xff] %v197_v15 }
  0x24   : > { %200 = vst [vmem:[%s720_s26 + $0x80] sm:$0xff] %v199_v16 }
  0x25   : > { %202 = vst [vmem:[%s720_s26 + $0x88] sm:$0xff] %v201_v17 }
  0x26   : > { %204 = vst [vmem:[%s720_s26 + $0x90] sm:$0xff] %v203_v18 }
  0x27   : > { %206 = vst [vmem:[%s720_s26 + $0x98] sm:$0xff] %v205_v19 }
  0x28   : > { %208 = vst [vmem:[%s720_s26 + $0xa0] sm:$0xff] %v207_v20 }
  0x29   : > { %210 = vst [vmem:[%s720_s26 + $0xa8] sm:$0xff] %v209_v21 }
  0x2a   : > { %212 = vst [vmem:[%s720_s26 + $0xb0] sm:$0xff] %v211_v22 }
  0x2b   : > { %214 = vst [vmem:[%s720_s26 + $0xb8] sm:$0xff] %v213_v23 }
  0x2c   : > { %216 = vst [vmem:[%s720_s26 + $0xc0] sm:$0xff] %v215_v24 }
  0x2d   : > { %218 = vst [vmem:[%s720_s26 + $0xc8] sm:$0xff] %v217_v25 }
  0x2e   : > { %220 = vst [vmem:[%s720_s26 + $0xd0] sm:$0xff] %v219_v26 }
  0x2f   : > { %222 = vst [vmem:[%s720_s26 + $0xd8] sm:$0xff] %v221_v27 }
  0x30   : > { %224 = vst [vmem:[%s720_s26 + $0xe0] sm:$0xff] %v223_v28 }
  0x31   : > { %226 = vst [vmem:[%s720_s26 + $0xe8] sm:$0xff] %v225_v29 }
  0x32   : > { %228 = vst [vmem:[%s720_s26 + $0xf0] sm:$0xff] %v227_v30 }
  0x33   : > { %230 = vst [vmem:[%s720_s26 + $0xf8] sm:$0xff] %v229_v31 }
  0x34 PF: > { %p530_p8 = scmp.ge.s32.totalorder %s650_s13, 1  ;;  %p235_p9 = scmp.lt.s32.totalorder %s650_s13, 4 }
  0x36   : > { %p236_p10 = pnand %p530_p8, %p235_p9 }
  0x37   : > { %s242_s27 = sand.u32 (!%p236_p10), 1, %s634_s9  }
  0x38   : > { %239 = sbr.rel (%p236_p10) target bundleno = 235 (0xeb), region = 47  ;;  %s531_s28 = sshll.u32 (!%p236_p10), %s242_s27, 8 }
  0x39   : > { %s788_s29 = scalar_lea.vmem (!%p236_p10), [#allocation3], %s531_s28  ;;  %s532_s6 = sshll.u32 (!%p236_p10), %s242_s27, 5 }
  0x3a   : > { %s269_s7 = scalar_lea.vmem (!%p236_p10), [#allocation4], %s532_s6 }
  0x3d   : > { %v327_v32 = vld [vmem:[%s788_s29 + $0xf0] sm:$0xff]  ;;  %v328_v33 = vld [vmem:[%s788_s29 + $0xf8] sm:$0xff]  ;;  %v325_v34 = vld [vmem:[%s788_s29 + $0xe0] sm:$0xff]  ;;  %s539_s8 = sshll.u32 (%p702_p6), %s642_s11, 4 }
  0x3e   : > { %540 = vmatpush.msra.mxu2 %v327_v32  ;;  %556 = vmatpush.msra.mxu3 %v328_v33  ;;  %v326_v35 = vld [vmem:[%s788_s29 + $0xe8] sm:$0xff]  ;;  %v323_v36 = vld [vmem:[%s788_s29 + $0xd0] sm:$0xff]  ;;  %v324_v37 = vld [vmem:[%s788_s29 + $0xd8] sm:$0xff]  ;;  %s406_s9 = scalar_lea.vmem (%p702_p6), %s853_s2, %s539_s8 }
  0x3f   : > { %329 = vmatpush.msra.mxu0 %v327_v32  ;;  %352 = vmatpush.msra.mxu1 %v328_v33  ;;  %v321_v38 = vld [vmem:[%s788_s29 + $0xc0] sm:$0xff]  ;;  %v322_v39 = vld [vmem:[%s788_s29 + $0xc8] sm:$0xff]  ;;  %v319_v40 = vld [vmem:[%s788_s29 + $0xb0] sm:$0xff] }
  0x40   : > { %541 = vmatpush.msra.mxu2 %v325_v34  ;;  %557 = vmatpush.msra.mxu3 %v326_v35  ;;  %v320_v41 = vld [vmem:[%s788_s29 + $0xb8] sm:$0xff]  ;;  %v317_v42 = vld [vmem:[%s788_s29 + $0xa0] sm:$0xff]  ;;  %v318_v43 = vld [vmem:[%s788_s29 + $0xa8] sm:$0xff] }
  0x41   : > { %330 = vmatpush.msra.mxu0 %v325_v34  ;;  %353 = vmatpush.msra.mxu1 %v326_v35  ;;  %v315_v44 = vld [vmem:[%s788_s29 + $0x90] sm:$0xff]  ;;  %v316_v45 = vld [vmem:[%s788_s29 + $0x98] sm:$0xff]  ;;  %v313_v46 = vld [vmem:[%s788_s29 + $0x80] sm:$0xff] }
  0x42   : > { %542 = vmatpush.msra.mxu2 %v323_v36  ;;  %558 = vmatpush.msra.mxu3 %v324_v37  ;;  %v314_v47 = vld [vmem:[%s788_s29 + $0x88] sm:$0xff]  ;;  %v311_v48 = vld [vmem:[%s788_s29 + $0x70] sm:$0xff]  ;;  %v312_v49 = vld [vmem:[%s788_s29 + $0x78] sm:$0xff] }
  0x43   : > { %331 = vmatpush.msra.mxu0 %v323_v36  ;;  %354 = vmatpush.msra.mxu1 %v324_v37  ;;  %v309_v50 = vld [vmem:[%s788_s29 + $0x60] sm:$0xff]  ;;  %v310_v51 = vld [vmem:[%s788_s29 + $0x68] sm:$0xff]  ;;  %v307_v52 = vld [vmem:[%s788_s29 + $0x50] sm:$0xff] }
  0x44   : > { %543 = vmatpush.msra.mxu2 %v321_v38  ;;  %559 = vmatpush.msra.mxu3 %v322_v39  ;;  %v308_v53 = vld [vmem:[%s788_s29 + $0x58] sm:$0xff]  ;;  %v305_v54 = vld [vmem:[%s788_s29 + $0x40] sm:$0xff]  ;;  %v306_v55 = vld [vmem:[%s788_s29 + $0x48] sm:$0xff] }
  0x45   : > { %332 = vmatpush.msra.mxu0 %v321_v38  ;;  %355 = vmatpush.msra.mxu1 %v322_v39  ;;  %v303_v56 = vld [vmem:[%s788_s29 + $0x30] sm:$0xff]  ;;  %v304_v57 = vld [vmem:[%s788_s29 + $0x38] sm:$0xff]  ;;  %v301_v58 = vld [vmem:[%s788_s29 + $0x20] sm:$0xff] }
  0x46   : > { %544 = vmatpush.msra.mxu2 %v319_v40  ;;  %560 = vmatpush.msra.mxu3 %v320_v41  ;;  %v302_v59 = vld [vmem:[%s788_s29 + $0x28] sm:$0xff]  ;;  %v299_v60 = vld [vmem:[%s788_s29 + $0x10] sm:$0xff]  ;;  %v300_v61 = vld [vmem:[%s788_s29 + $0x18] sm:$0xff] }
  0x47   : > { %333 = vmatpush.msra.mxu0 %v319_v40  ;;  %356 = vmatpush.msra.mxu1 %v320_v41  ;;  %v297_v62 = vld [vmem:[%s788_s29] sm:$0xff]  ;;  %v298_v63 = vld [vmem:[%s788_s29 + $0x8] sm:$0xff] }
  0x48   : > { %545 = vmatpush.msra.mxu2 %v317_v42  ;;  %561 = vmatpush.msra.mxu3 %v318_v43  ;;  %v296_v0 = vld [vmem:[%s851_s0 + $0x8] sm:$0xff]  ;;  %v295_v1 = vld [vmem:[%s851_s0] sm:$0xff] }
  0x49   : > { %334 = vmatpush.msra.mxu0 %v317_v42  ;;  %357 = vmatpush.msra.mxu1 %v318_v43 }
  0x4a   : > { %546 = vmatpush.msra.mxu2 %v315_v44  ;;  %562 = vmatpush.msra.mxu3 %v316_v45 }
  0x4b   : > { %335 = vmatpush.msra.mxu0 %v315_v44  ;;  %358 = vmatpush.msra.mxu1 %v316_v45 }
  0x4c   : > { %547 = vmatpush.msra.mxu2 %v313_v46  ;;  %563 = vmatpush.msra.mxu3 %v314_v47 }
  0x4d   : > { %336 = vmatpush.msra.mxu0 %v313_v46  ;;  %359 = vmatpush.msra.mxu1 %v314_v47 }
  0x4e   : > { %548 = vmatpush.msra.mxu2 %v311_v48  ;;  %564 = vmatpush.msra.mxu3 %v312_v49 }
  0x4f   : > { %337 = vmatpush.msra.mxu0 %v311_v48  ;;  %360 = vmatpush.msra.mxu1 %v312_v49 }
  0x50   : > { %549 = vmatpush.msra.mxu2 %v309_v50  ;;  %565 = vmatpush.msra.mxu3 %v310_v51 }
  0x51   : > { %338 = vmatpush.msra.mxu0 %v309_v50  ;;  %361 = vmatpush.msra.mxu1 %v310_v51 }
  0x52   : > { %550 = vmatpush.msra.mxu2 %v307_v52  ;;  %566 = vmatpush.msra.mxu3 %v308_v53 }
  0x53   : > { %339 = vmatpush.msra.mxu0 %v307_v52  ;;  %362 = vmatpush.msra.mxu1 %v308_v53 }
  0x54   : > { %551 = vmatpush.msra.mxu2 %v305_v54  ;;  %567 = vmatpush.msra.mxu3 %v306_v55 }
  0x55   : > { %340 = vmatpush.msra.mxu0 %v305_v54  ;;  %363 = vmatpush.msra.mxu1 %v306_v55 }
  0x56   : > { %552 = vmatpush.msra.mxu2 %v303_v56  ;;  %568 = vmatpush.msra.mxu3 %v304_v57 }
  0x57   : > { %341 = vmatpush.msra.mxu0 %v303_v56  ;;  %364 = vmatpush.msra.mxu1 %v304_v57 }
  0x58   : > { %553 = vmatpush.msra.mxu2 %v301_v58  ;;  %569 = vmatpush.msra.mxu3 %v302_v59 }
  0x59   : > { %342 = vmatpush.msra.mxu0 %v301_v58  ;;  %365 = vmatpush.msra.mxu1 %v302_v59 }
  0x5a   : > { %554 = vmatpush.msra.mxu2 %v299_v60  ;;  %570 = vmatpush.msra.mxu3 %v300_v61 }
  0x5b   : > { %343 = vmatpush.msra.mxu0 %v299_v60  ;;  %366 = vmatpush.msra.mxu1 %v300_v61 }
  0x5c   : > { %555 = vmatpush.msra.mxu2 %v297_v62  ;;  %571 = vmatpush.msra.mxu3 %v298_v63 }
  0x5d   : > { %348 = vmatmul.f32.vlgmr.msra.gmra.mxu2 %v296_v0  ;;  %371 = vmatmul.f32.vlgmr.msra.gmra.mxu3 %v296_v0 }
  0x5e   : > { %344 = vmatpush.msra.mxu0 %v297_v62  ;;  %367 = vmatpush.msra.mxu1 %v298_v63 }
  0x5f   : > { %345 = vmatmul.f32.vlgmr.msra.gmra.mxu0 %v295_v1  ;;  %368 = vmatmul.f32.vlgmr.msra.gmra.mxu1 %v295_v1 }
  0xdc   : > { %v346_v2 = vpop.f32.mrf.mxu0  ;;  %v369_v3 = vpop.f32.mrf.mxu1 }
  0xdd   : > { %390 = vst [vmem:[%s269_s7] sm:$0xff] %v346_v2 }
  0xde   : > { %391 = vst [vmem:[%s269_s7 + $0x8] sm:$0xff] %v369_v3  ;;  %400 = sbr.rel (!%p702_p6) target bundleno = 235 (0xeb), region = 63 }
  0xe0   : > { %v349_v4 = vpop.f32.mrf.mxu2  ;;  %v372_v5 = vpop.f32.mrf.mxu3 }
  0xe1   : > { %392 = vst [vmem:[%s269_s7 + $0x10] sm:$0xff] %v349_v4 }
  0xe2   : > { %393 = vst [vmem:[%s269_s7 + $0x18] sm:$0xff] %v372_v5 }
  0xe4   : > { %v419_v6 = vld [vmem:[%s269_s7] sm:$0xff] }
  0xe5   : > { %v421_v7 = vld [vmem:[%s269_s7 + $0x8] sm:$0xff]  ;;  %420 = vst [vmem:[%s406_s9] sm:$0xff] %v419_v6 }
  0xe6   : > { %422 = vst [vmem:[%s406_s9 + $0x8] sm:$0xff] %v421_v7 }
  0xe8   : > { %v423_v8 = vld [vmem:[%s269_s7 + $0x10] sm:$0xff] }
  0xe9   : > { %v425_v9 = vld [vmem:[%s269_s7 + $0x18] sm:$0xff]  ;;  %424 = vst [vmem:[%s406_s9 + $0x30] sm:$0xff] %v423_v8 }
  0xea   : > { %426 = vst [vmem:[%s406_s9 + $0x38] sm:$0xff] %v425_v9 }
  0xeb PF: > { %s12_s13 = sadd.s32 1, %s650_s13   ;;  %s855_s9 = smov %s638_s10 }
  0xec   : > { %p9_p11 = scmp.ge.s32.totalorder %s12_s13, 5   ;;  %s856_s10 = smov %s707_s19 }
  0xed   : > { %s857_s11 = smov %s646_s12  ;;  %s858_s12 = smov %s860_s14 }
  0xee   :  { %11 = sbr.rel (!%p9_p11) target bundleno = 3 (0x3), region = 120 }

// kernel: attention_forward.4
= control target key start
LH: loop header
LB: loop body
LE: loop exit
PB: predicated region body
PF: predicated region fallthrough
CT: control target
= control target key end

     0   :  { %s998_s12 = smov 0   ;;  %s1000_s13 = smov 0   ;;  %s1114_s0 = inlined_call_operand.vmem [shape: f32[2,8,768], index: 0, kind: input, shape index: {}, may-alias: {0,1,2}]   ;;  %s1115_s1 = inlined_call_operand.vmem [shape: f32[2,8,768], index: 1, kind: input, shape index: {}, may-alias: {0,1,2}]   ;;  %s1116_s2 = inlined_call_operand.vmem [shape: f32[2,8,768], index: 2, kind: input, shape index: {}, may-alias: {0,1,2}]   ;;  %s1117_s3 = inlined_call_operand.vmem [shape: f32[2,8,256], index: 3, kind: output, shape index: {}]  }
   0x1   :  { %s1002_s14 = smov 0  }
   0x2 LB: > { %s32_s15 = sadd.s32 1, %s968_s13  ;;  %p864_p0 = scmp.ge.s32.totalorder %s972_s14, 1  ;;  %s972_s14 = sphi %s1002_s14, %s13_s14   ;;  %s968_s13 = sphi %s1000_s13, %s1119_s13   ;;  %s964_s12 = sphi %s998_s12, %s1118_s12  }
   0x3   : > { %p34_p1 = scmp.ge.s32.totalorder %s32_s15, 2  ;;  %p198_p2 = scmp.lt.s32.totalorder %s972_s14, 3 }
   0x5   : > { %s1121_s15 = smov (%p34_p1, %s32_s15), 0  ;;  %p199_p3 = pnand %p864_p0, %p198_p2 }
   0x6   : > { %p250_p4 = scmp.lt.s32.totalorder (!%p199_p3), %s964_s12, 1  ;;  %s974_s23 = smov (!%p199_p3), 64  }
   0x7   : > { %202 = sbr.rel (%p199_p3) target bundleno = 1073 (0x431), region = 32 }
   0xc   : > { %s1123_s12 = smov (!%p250_p4, %s964_s12), 1  ;;  %vm301_vm0 = vcmask 523264   ;;  %vm292_vm1 = vcmask 7168   ;;  %v975_v7 = vmov -1e+30   ;;  %vm342_vm2 = vcmask 64512  }
   0xd   : > { %s1019_s16 = smul.u32 48, %s1123_s12  ;;  %293 = vst.msk [vmem:[#allocation2] sm:$0xff] %vm292_vm1, %v975_v7  ;;  %v976_v12 = vmov 0   ;;  %v977_v13 = vmov 0.0   ;;  %s888_s27 = sshll.u32 %s1123_s12, 4 }
   0xe   : > { %294 = vst.msk [vmem:[#allocation2 + $0x8] sm:$0xff] %vm292_vm1, %v975_v7  ;;  %918 = vset.pattern.permute.xlu2 %v976_v12  ;;  %919 = vset.pattern.permute.xlu1 %v976_v12  ;;  %s287_s30 = scalar_lea.vmem %s1117_s3, %s888_s27 }
   0xf   : > { %s794_s19 = scalar_lea.vmem %s1115_s1, %s1019_s16  ;;  %s258_s22 = scalar_lea.vmem %s1114_s0, %s1019_s16  ;;  %295 = vst.msk [vmem:[#allocation2 + $0x10] sm:$0xff] %vm292_vm1, %v975_v7  ;;  %925 = vset.pattern.permute.xlu0 %v976_v12 }
  0x10   : > { %v870_v0 = vld [vmem:[%s794_s19 + $0x10] sm:$0xff]  ;;  %v306_v1 = vld [vmem:[%s258_s22] sm:$0xff]  ;;  %v307_v3 = vld [vmem:[%s258_s22 + $0x8] sm:$0xff]  ;;  %296 = vst.msk [vmem:[#allocation2 + $0x18] sm:$0xff] %vm292_vm1, %v975_v7  ;;  %s800_s26 = scalar_lea.vmem %s1116_s2, %s1019_s16 }
  0x11   : > { %874 = vmatpush.xpose.msk.msra.mxu0 %vm301_vm0, %v870_v0  ;;  %v308_v2 = vmul.f32 0.125, %v306_v1  ;;  %v309_v4 = vmul.f32 0.125, %v307_v3  ;;  %v871_v5 = vld [vmem:[%s794_s19 + $0x18] sm:$0xff]  ;;  %297 = vst.msk [vmem:[#allocation3] sm:$0xff] %vm292_vm1, %v977_v13  ;;  %v872_v21 = vld [vmem:[%s800_s26 + $0x20] sm:$0xff]  ;;  %v873_v38 = vld [vmem:[%s800_s26 + $0x28] sm:$0xff] }
  0x12   : > { %298 = vst.msk [vmem:[#allocation3 + $0x8] sm:$0xff] %vm292_vm1, %v977_v13  ;;  %391 = vmatpush.msra.mxu1 %v872_v21  ;;  %v920_v39 = vpack.i.bf16 %v873_v38, %v872_v21 }
  0x13   : > { %399 = vrot.lane.b32.xlu1 %v308_v2, %s974_s23  ;;  %575 = vrot.lane.b32.xlu2 %v309_v4, %s974_s23  ;;  %299 = vst.msk [vmem:[#allocation3 + $0x10] sm:$0xff] %vm292_vm1, %v977_v13 }
  0x14   : > { %875 = vmatmul.msk.f32.vlgmr.msra.gmra.mxu0 %vm301_vm0, %v308_v2  ;;  %300 = vst.msk [vmem:[#allocation3 + $0x18] sm:$0xff] %vm292_vm1, %v977_v13  ;;  %v341_v14 = vld [vmem:[#allocation2] sm:$0xff]  ;;  %880 = vmatpush.xpose.msk.msrb.mxu1 %vm301_vm0, %v871_v5 }
  0x15   : > { %302 = vst.msk [vmem:[#allocation4] sm:$0xff] %vm301_vm0, %v977_v13  ;;  %v428_v40 = vld [vmem:[#allocation2 + $0x8] sm:$0xff] }
  0x16   : > { %303 = vst.msk [vmem:[#allocation4 + $0x8] sm:$0xff] %vm301_vm0, %v977_v13  ;;  %v517_v51 = vld [vmem:[#allocation2 + $0x10] sm:$0xff] }
  0x17   : > { %304 = vst.msk [vmem:[#allocation4 + $0x10] sm:$0xff] %vm301_vm0, %v977_v13  ;;  %v604_v28 = vld [vmem:[#allocation2 + $0x18] sm:$0xff] }
  0x18   : > { %305 = vst.msk [vmem:[#allocation4 + $0x18] sm:$0xff] %vm301_vm0, %v977_v13  ;;  %v358_v47 = vld [vmem:[#allocation3] sm:$0xff] }
  0x1b   : > { %577 = vrot.lane.b32.xlu1 %v871_v5, %s974_s23 }
  0x1c   : > { %v366_v12 = vld [vmem:[#allocation4] sm:$0xff] }
  0x6d   : > { %v576_v9 = vpop.permute.xlu2 %575 }
  0x85   : > { %v400_v6 = vpop.permute.xlu1 %399 }
  0x8d   : > { %v578_v8 = vpop.permute.xlu1 %577 }
  0x8e   : > { %883 = vmatpush.xpose.msk.msrb.mxu0 %vm301_vm0, %v578_v8 }
  0x91   : > { %v338_v10 = vpop.f32.mrf.mxu0  ;;  %884 = vmatmul.msk.f32.vlgmr.msrb.gmra.mxu0 %vm301_vm0, %v576_v9 }
  0x92   : > { %v343_v11 = vsel %vm342_vm2, %v338_v10, -inf }
  0x93   : > { %344 = vmax.xlane.f32.xlu0 %v343_v11 }
  0xa7   : > { %401 = vrot.lane.b32.xlu0 %v870_v0, %s974_s23 }
 0x106   : > { %v345_v15 = vpop.xlane.xlu0 %344 }
 0x107   : > { %v346_v16 = vmax.f32 %v341_v14, %v345_v15 }
 0x109   : > { %v347_v17 = vsub.f32 %v341_v14, %v346_v16  ;;  %398 = vst.msk [vmem:[#allocation2] sm:$0xff] %vm292_vm1, %v346_v16  ;;  %352 = vperm.xlu2 %918, %v346_v16  }
 0x10b   : > { %v348_v44 = vmul.f32 1.442695, %v347_v17  ;;  %v445_v17 = vld [vmem:[#allocation3 + $0x8] sm:$0xff] }
 0x10e   : > { %v1053_v19 = vpop.f32.mrf.mxu0 }
 0x10f   : > { %v605_v20 = vsel %vm342_vm2, %v1053_v19, -inf }
 0x119   : > { %v402_v18 = vpop.permute.xlu0 %401 }
 0x11a   : > { %877 = vmatpush.xpose.msk.msra.mxu2 %vm301_vm0, %v402_v18 }
 0x11d   : > { %878 = vmatmul.msk.f32.vlgmr.msra.gmra.mxu2 %vm301_vm0, %v400_v6 }
 0x132   : > { %606 = vmax.xlane.f32.xlu2 %v605_v20 }
 0x163   : > { %v353_v22 = vpop.permute.xlu2 %352 }
 0x164   : > { %v355_v23 = vsub.f32 %v338_v10, %v353_v22  ;;  %v453_v22 = vld [vmem:[#allocation4 + $0x8] sm:$0xff] }
 0x166   : > { %v356_v24 = vmul.f32 1.442695, %v355_v23 }
 0x168   : > { %926 = vpow2.f32 %v356_v24  ;;  %v629_v24 = vld [vmem:[#allocation4 + $0x18] sm:$0xff] }
 0x16e   : > { %v927_v25 = vpop.eup %926 }
 0x16f   : > { %876 = vmatmul.msk.f32.vlgmr.msra.gmra.mxu1 %vm342_vm2, %v927_v25  ;;  %v360_v32 = vsel %vm342_vm2, %v927_v25, 0.0 }
 0x177   : > { %881 = vmatmul.msk.f32.vlgmr.msrb.gmra.mxu1 %vm301_vm0, %v309_v4 }
 0x1a0   : > { %v424_v26 = vpop.f32.mrf.mxu2 }
 0x1a1   : > { %v429_v27 = vsel %vm342_vm2, %v424_v26, -inf }
 0x1a2   : > { %430 = vmax.xlane.f32.xlu1 %v429_v27 }
 0x1a5   : > { %v607_v29 = vpop.xlane.xlu2 %606 }
 0x1a6   : > { %v608_v30 = vmax.f32 %v604_v28, %v607_v29 }
 0x1a8   : > { %v609_v31 = vsub.f32 %v604_v28, %v608_v30  ;;  %665 = vst.msk [vmem:[#allocation2 + $0x18] sm:$0xff] %vm292_vm1, %v608_v30 }
 0x1aa   : > { %v610_v34 = vmul.f32 1.442695, %v609_v31 }
 0x1ac   : > { %928 = vpow2.f32 %v610_v34 }
 0x1ad   : > { %930 = vpow2.f32 %v348_v44 }
 0x1b2   : > { %v1073_v37 = vpop.eup %928 }
 0x1b3   : > { %v931_v46 = vpop.eup %930 }
 0x1b4   : > { %v359_v48 = vmul.f32 %v931_v46, %v358_v47 }
 0x1bb   : > { %614 = vperm.xlu1 %919, %v608_v30  }
 0x1e5   : > { %361 = vadd.xlane.f32.xlu1 %v360_v32 }
 0x1ec   : > { %v1067_v33 = vpop.f32.mrf.mxu1 }
 0x1f4   : > { %v1069_v35 = vpop.f32.mrf.mxu1 }
 0x1f5   : > { %v518_v36 = vsel %vm342_vm2, %v1069_v35, -inf }
 0x1f6   : > { %519 = vmax.xlane.f32.xlu0 %v518_v36 }
 0x1fe   : > { %632 = vperm.xlu1 %919, %v1073_v37  }
 0x20a   : > { %921 = vrot.lane.b32.xlu0 %v920_v39, %s974_s23 }
 0x215   : > { %v431_v41 = vpop.xlane.xlu1 %430 }
 0x216   : > { %v432_v42 = vmax.f32 %v428_v40, %v431_v41  ;;  %v542_v41 = vld [vmem:[#allocation4 + $0x10] sm:$0xff] }
 0x218   : > { %v433_v43 = vsub.f32 %v428_v40, %v432_v42  ;;  %489 = vst.msk [vmem:[#allocation2 + $0x8] sm:$0xff] %vm292_vm1, %v432_v42  ;;  %438 = vperm.xlu2 %918, %v432_v42  }
 0x21a   : > { %v434_v54 = vmul.f32 1.442695, %v433_v43 }
 0x21c   : > { %932 = vpow2.f32 %v434_v54 }
 0x222   : > { %v933_v60 = vpop.eup %932 }
 0x223   : > { %v446_v18 = vmul.f32 %v933_v60, %v445_v17 }
 0x22d   : > { %v615_v45 = vpop.permute.xlu1 %614 }
 0x22e   : > { %v617_v55 = vsub.f32 %v1053_v19, %v615_v45 }
 0x230   : > { %v618_v59 = vmul.f32 1.442695, %v617_v55 }
 0x258   : > { %v362_v49 = vpop.xlane.xlu1 %361 }
 0x259   : > { %v363_v50 = vadd.f32 %v362_v49, %v359_v48  ;;  %v534_v48 = vld [vmem:[#allocation3 + $0x10] sm:$0xff] }
 0x25b   : > { %365 = vst.msk [vmem:[#allocation3] sm:$0xff] %vm292_vm1, %v363_v50 }
 0x262   : > { %v670_v7 = vld [vmem:[#allocation3] sm:$0xff] }
 0x269   : > { %v520_v52 = vpop.xlane.xlu0 %519 }
 0x26a   : > { %v521_v53 = vmax.f32 %v517_v51, %v520_v52 }
 0x26c   : > { %574 = vst.msk [vmem:[#allocation2 + $0x10] sm:$0xff] %vm292_vm1, %v521_v53  ;;  %527 = vperm.xlu2 %918, %v521_v53   ;;  %v522_v3 = vsub.f32 %v517_v51, %v521_v53 }
 0x26e   : > { %v523_v4 = vmul.f32 1.442695, %v522_v3 }
 0x270   : > { %v633_v25 = vpop.permute.xlu1 %632 }
 0x271   : > { %v635_v28 = vmul.f32 %v633_v25, %v629_v24 }
 0x272   : > { %v439_v56 = vpop.permute.xlu2 %438 }
 0x273   : > { %v441_v57 = vsub.f32 %v424_v26, %v439_v56 }
 0x274   : > { %369 = vperm.xlu2 %918, %v931_v46  }
 0x275   : > { %v442_v58 = vmul.f32 1.442695, %v441_v57 }
 0x277   : > { %934 = vpow2.f32 %v442_v58 }
 0x278   : > { %936 = vpow2.f32 %v618_v59 }
 0x279   : > { %938 = vpow2.f32 %v523_v4 }
 0x27a   : > { %940 = vrcp.f32 %v670_v7 }
 0x27c   : > { %456 = vperm.xlu2 %918, %v933_v60   ;;  %v922_v61 = vpop.permute.xlu0 %921 }
 0x27d   : > { %v935_v62 = vpop.eup %934  ;;  %v923_v63 = vunpack.i.l.bf16 %v922_v61  ;;  %v924_v0 = vunpack.i.h.bf16 %v922_v61 }
 0x27e   : > { %v447_v1 = vsel %vm342_vm2, %v935_v62, 0.0  ;;  %v937_v2 = vpop.eup %936 }
 0x27f   : > { %448 = vadd.xlane.f32.xlu0 %v447_v1  ;;  %482 = vmatpush.msra.mxu3 %v923_v63  ;;  %v939_v5 = vpop.eup %938  ;;  %v623_v6 = vsel %vm342_vm2, %v937_v2, 0.0 }
 0x280   : > { %658 = vmatpush.msrb.mxu2 %v924_v0  ;;  %879 = vmatmul.msk.f32.vlgmr.msra.gmra.mxu3 %vm342_vm2, %v935_v62  ;;  %v941_v8 = vpop.eup %940  ;;  %v535_v49 = vmul.f32 %v939_v5, %v534_v48 }
 0x281   : > { %885 = vmatmul.msk.f32.vlgmr.msrb.gmra.mxu2 %vm342_vm2, %v937_v2  ;;  %567 = vmatpush.msrb.mxu3 %v873_v38 }
 0x293   : > { %545 = vperm.xlu0 %925, %v939_v5  }
 0x2a5   : > { %624 = vadd.xlane.f32.xlu2 %v623_v6 }
 0x2bd   : > { %674 = vperm.xlu2 %918, %v941_v8  }
 0x2c6   : > { %v528_v9 = vpop.permute.xlu2 %527 }
 0x2c7   : > { %v530_v10 = vsub.f32 %v1069_v35, %v528_v9 }
 0x2c9   : > { %v531_v11 = vmul.f32 1.442695, %v530_v10 }
 0x2cb   : > { %942 = vpow2.f32 %v531_v11 }
 0x2ce   : > { %v370_v13 = vpop.permute.xlu2 %369 }
 0x2cf   : > { %v372_v14 = vmul.f32 %v370_v13, %v366_v12 }
 0x2d1   : > { %v943_v15 = vpop.eup %942  ;;  %v396_v16 = vadd.f32 %v1067_v33, %v372_v14  ;;  %v621_v33 = vld [vmem:[#allocation3 + $0x18] sm:$0xff] }
 0x2d2   : > { %882 = vmatmul.msk.f32.vlgmr.msrb.gmra.mxu3 %vm342_vm2, %v943_v15  ;;  %v622_v34 = vmul.f32 %v1073_v37, %v621_v33  ;;  %v536_v38 = vsel %vm342_vm2, %v943_v15, 0.0 }
 0x2d3   : > { %397 = vst.msk [vmem:[#allocation4] sm:$0xff] %vm301_vm0, %v396_v16 }
 0x2d6   : > { %v457_v23 = vpop.permute.xlu2 %456 }
 0x2d7   : > { %v459_v26 = vmul.f32 %v457_v23, %v453_v22 }
 0x2da   : > { %v669_v58 = vld [vmem:[#allocation4] sm:$0xff] }
 0x2f2   : > { %v449_v19 = vpop.xlane.xlu0 %448 }
 0x2f3   : > { %v450_v20 = vadd.f32 %v449_v19, %v446_v18 }
 0x2f5   : > { %451 = vst.msk [vmem:[#allocation3 + $0x8] sm:$0xff] %vm292_vm1, %v450_v20 }
 0x2fc   : > { %v679_v21 = vld [vmem:[#allocation3 + $0x8] sm:$0xff] }
 0x2fd   : > { %944 = vrcp.f32 %v679_v21 }
 0x303   : > { %v945_v27 = vpop.eup %944  ;;  %v484_v29 = vpop.f32.mrf.mxu3 }
 0x304   : > { %v487_v30 = vadd.f32 %v484_v29, %v459_v26  ;;  %v660_v31 = vpop.f32.mrf.mxu2  ;;  %683 = vperm.xlu1 %919, %v945_v27  }
 0x305   : > { %v663_v32 = vadd.f32 %v660_v31, %v635_v28  ;;  %v546_v42 = vpop.permute.xlu0 %545 }
 0x306   : > { %488 = vst.msk [vmem:[#allocation4 + $0x8] sm:$0xff] %vm301_vm0, %v487_v30  ;;  %v548_v43 = vmul.f32 %v546_v42, %v542_v41 }
 0x307   : > { %664 = vst.msk [vmem:[#allocation4 + $0x18] sm:$0xff] %vm301_vm0, %v663_v32 }
 0x30d   : > { %v678_v37 = vld [vmem:[#allocation4 + $0x8] sm:$0xff] }
 0x30e   : > { %v696_v55 = vld [vmem:[#allocation4 + $0x18] sm:$0xff] }
 0x318   : > { %v625_v35 = vpop.xlane.xlu2 %624 }
 0x319   : > { %v626_v36 = vadd.f32 %v625_v35, %v622_v34 }
 0x31b   : > { %627 = vst.msk [vmem:[#allocation3 + $0x18] sm:$0xff] %vm292_vm1, %v626_v36 }
 0x320   : > { %v675_v57 = vpop.permute.xlu2 %674 }
 0x321   : > { %v677_v59 = vmul.f32 %v675_v57, %v669_v58 }
 0x322   : > { %v697_v39 = vld [vmem:[#allocation3 + $0x18] sm:$0xff] }
 0x323   : > { %946 = vrcp.f32 %v697_v39 }
 0x329   : > { %v947_v40 = vpop.eup %946 }
 0x32e   : > { %537 = vadd.xlane.f32.xlu1 %v536_v38 }
 0x347   : > { %701 = vperm.xlu1 %919, %v947_v40  }
 0x355   : > { %v569_v44 = vpop.f32.mrf.mxu3 }
 0x356   : > { %v572_v45 = vadd.f32 %v569_v44, %v548_v43 }
 0x358   : > { %573 = vst.msk [vmem:[#allocation4 + $0x10] sm:$0xff] %vm301_vm0, %v572_v45 }
 0x35f   : > { %v687_v63 = vld [vmem:[#allocation4 + $0x10] sm:$0xff] }
 0x376   : > { %v684_v46 = vpop.permute.xlu1 %683 }
 0x377   : > { %v686_v47 = vmul.f32 %v684_v46, %v678_v37 }
 0x379   : > { %706 = vrot.lane.b32.xlu0 %v686_v47, %s974_s23 }
 0x3a1   : > { %v538_v50 = vpop.xlane.xlu1 %537 }
 0x3a2   : > { %v539_v51 = vadd.f32 %v538_v50, %v535_v49 }
 0x3a4   : > { %540 = vst.msk [vmem:[#allocation3 + $0x10] sm:$0xff] %vm292_vm1, %v539_v51 }
 0x3ab   : > { %v688_v52 = vld [vmem:[#allocation3 + $0x10] sm:$0xff] }
 0x3ac   : > { %948 = vrcp.f32 %v688_v52 }
 0x3b2   : > { %v949_v53 = vpop.eup %948 }
 0x3b3   : > { %692 = vperm.xlu2 %918, %v949_v53  }
 0x3b9   : > { %v702_v54 = vpop.permute.xlu1 %701 }
 0x3ba   : > { %v704_v56 = vmul.f32 %v702_v54, %v696_v55 }
 0x3bc   : > { %710 = vrot.lane.b32.xlu1 %v704_v56, %s974_s23 }
 0x3eb   : > { %v707_v60 = vpop.permute.xlu0 %706 }
 0x3ec   : > { %v713_v61 = vsel %vm301_vm0, %v677_v59, %v707_v60 }
 0x3ed   : > { %715 = vst [vmem:[%s287_s30] sm:$0xff] %v713_v61 }
 0x40d   : > { %v693_v62 = vpop.permute.xlu2 %692 }
 0x40e   : > { %v695_v0 = vmul.f32 %v693_v62, %v687_v63 }
 0x42e   : > { %v711_v1 = vpop.permute.xlu1 %710 }
 0x42f   : > { %v714_v2 = vsel %vm301_vm0, %v695_v0, %v711_v1 }
 0x430   : > { %716 = vst [vmem:[%s287_s30 + $0x8] sm:$0xff] %v714_v2 }
 0x431 PF: > { %s13_s14 = sadd.s32 1, %s972_s14   ;;  %s1118_s12 = smov %s968_s13 }
 0x432   : > { %p10_p5 = scmp.ge.s32.totalorder %s13_s14, 4   ;;  %s1119_s13 = smov %s1121_s15 }
 0x434   :  { %12 = sbr.rel (!%p10_p5) target bundleno = 2 (0x2), region = 85 }

// kernel: attention_forward.5
= control target key start
LH: loop header
LB: loop body
LE: loop exit
PB: predicated region body
PF: predicated region fallthrough
CT: control target
= control target key end

     0   :  { %s295_s1 = inlined_call_operand.vmem [shape: f32[256,128], index: 1, kind: input, shape index: {}]   ;;  %s296_s0 = inlined_call_operand.vmem [shape: f32[16,256], index: 0, kind: input, shape index: {}]   ;;  %s297_s2 = inlined_call_operand.vmem [shape: f32[1,128], index: 2, kind: input, shape index: {}]   ;;  %s298_s3 = inlined_call_operand.vmem [shape: f32[16,128], index: 3, kind: output, shape index: {}]  }
   0x1   :  { %v41_v0 = vld [vmem:[%s295_s1 + $0x78] sm:$0xff]  ;;  %v40_v2 = vld [vmem:[%s295_s1 + $0x70] sm:$0xff]  ;;  %v39_v4 = vld [vmem:[%s295_s1 + $0x68] sm:$0xff] }
   0x2   :  { %v57_v1 = vld [vmem:[%s295_s1 + $0xf8] sm:$0xff]  ;;  %125 = vmatpush.msra.mxu2 %v41_v0  ;;  %v56_v3 = vld [vmem:[%s295_s1 + $0xf0] sm:$0xff]  ;;  %v55_v5 = vld [vmem:[%s295_s1 + $0xe8] sm:$0xff]  ;;  %58 = vmatpush.msra.mxu0 %v41_v0 }
   0x3   :  { %141 = vmatpush.msra.mxu3 %v57_v1  ;;  %81 = vmatpush.msra.mxu1 %v57_v1  ;;  %v38_v6 = vld [vmem:[%s295_s1 + $0x60] sm:$0xff]  ;;  %v37_v8 = vld [vmem:[%s295_s1 + $0x58] sm:$0xff]  ;;  %v36_v10 = vld [vmem:[%s295_s1 + $0x50] sm:$0xff] }
   0x4   :  { %126 = vmatpush.msra.mxu2 %v40_v2  ;;  %v54_v7 = vld [vmem:[%s295_s1 + $0xe0] sm:$0xff]  ;;  %59 = vmatpush.msra.mxu0 %v40_v2  ;;  %v53_v9 = vld [vmem:[%s295_s1 + $0xd8] sm:$0xff]  ;;  %v52_v11 = vld [vmem:[%s295_s1 + $0xd0] sm:$0xff] }
   0x5   :  { %142 = vmatpush.msra.mxu3 %v56_v3  ;;  %82 = vmatpush.msra.mxu1 %v56_v3  ;;  %v35_v12 = vld [vmem:[%s295_s1 + $0x48] sm:$0xff]  ;;  %v34_v14 = vld [vmem:[%s295_s1 + $0x40] sm:$0xff]  ;;  %v33_v16 = vld [vmem:[%s295_s1 + $0x38] sm:$0xff] }
   0x6   :  { %127 = vmatpush.msra.mxu2 %v39_v4  ;;  %60 = vmatpush.msra.mxu0 %v39_v4  ;;  %v51_v13 = vld [vmem:[%s295_s1 + $0xc8] sm:$0xff]  ;;  %v50_v15 = vld [vmem:[%s295_s1 + $0xc0] sm:$0xff]  ;;  %v49_v17 = vld [vmem:[%s295_s1 + $0xb8] sm:$0xff] }
   0x7   :  { %143 = vmatpush.msra.mxu3 %v55_v5  ;;  %83 = vmatpush.msra.mxu1 %v55_v5  ;;  %v32_v18 = vld [vmem:[%s295_s1 + $0x30] sm:$0xff]  ;;  %v31_v20 = vld [vmem:[%s295_s1 + $0x28] sm:$0xff]  ;;  %v30_v22 = vld [vmem:[%s295_s1 + $0x20] sm:$0xff] }
   0x8   :  { %128 = vmatpush.msra.mxu2 %v38_v6  ;;  %61 = vmatpush.msra.mxu0 %v38_v6  ;;  %v48_v19 = vld [vmem:[%s295_s1 + $0xb0] sm:$0xff]  ;;  %v47_v21 = vld [vmem:[%s295_s1 + $0xa8] sm:$0xff]  ;;  %v46_v23 = vld [vmem:[%s295_s1 + $0xa0] sm:$0xff] }
   0x9   :  { %144 = vmatpush.msra.mxu3 %v54_v7  ;;  %84 = vmatpush.msra.mxu1 %v54_v7  ;;  %v29_v24 = vld [vmem:[%s295_s1 + $0x18] sm:$0xff]  ;;  %v28_v26 = vld [vmem:[%s295_s1 + $0x10] sm:$0xff]  ;;  %v27_v28 = vld [vmem:[%s295_s1 + $0x8] sm:$0xff] }
   0xa   :  { %129 = vmatpush.msra.mxu2 %v37_v8  ;;  %62 = vmatpush.msra.mxu0 %v37_v8  ;;  %v45_v25 = vld [vmem:[%s295_s1 + $0x98] sm:$0xff]  ;;  %v44_v27 = vld [vmem:[%s295_s1 + $0x90] sm:$0xff]  ;;  %v43_v29 = vld [vmem:[%s295_s1 + $0x88] sm:$0xff] }
   0xb   :  { %145 = vmatpush.msra.mxu3 %v53_v9  ;;  %85 = vmatpush.msra.mxu1 %v53_v9  ;;  %v26_v30 = vld [vmem:[%s295_s1] sm:$0xff]  ;;  %v24_v32 = vld [vmem:[%s296_s0 + $0x10] sm:$0xff]  ;;  %v25_v33 = vld [vmem:[%s296_s0 + $0x18] sm:$0xff] }
   0xc   :  { %130 = vmatpush.msra.mxu2 %v36_v10  ;;  %63 = vmatpush.msra.mxu0 %v36_v10  ;;  %v42_v31 = vld [vmem:[%s295_s1 + $0x80] sm:$0xff]  ;;  %v23_v35 = vld [vmem:[%s296_s0 + $0x8] sm:$0xff] }
   0xd   :  { %146 = vmatpush.msra.mxu3 %v52_v11  ;;  %86 = vmatpush.msra.mxu1 %v52_v11  ;;  %v22_v34 = vld [vmem:[%s296_s0] sm:$0xff] }
   0xe   :  { %131 = vmatpush.msra.mxu2 %v35_v12  ;;  %64 = vmatpush.msra.mxu0 %v35_v12  ;;  %v157_v36 = vld [vmem:[%s297_s2] ss:$0 sm:$0xff] }
   0xf   :  { %147 = vmatpush.msra.mxu3 %v51_v13  ;;  %87 = vmatpush.msra.mxu1 %v51_v13 }
  0x10   :  { %132 = vmatpush.msra.mxu2 %v34_v14  ;;  %65 = vmatpush.msra.mxu0 %v34_v14 }
  0x11   :  { %148 = vmatpush.msra.mxu3 %v50_v15  ;;  %88 = vmatpush.msra.mxu1 %v50_v15 }
  0x12   :  { %133 = vmatpush.msra.mxu2 %v33_v16  ;;  %66 = vmatpush.msra.mxu0 %v33_v16 }
  0x13   :  { %149 = vmatpush.msra.mxu3 %v49_v17  ;;  %89 = vmatpush.msra.mxu1 %v49_v17 }
  0x14   :  { %134 = vmatpush.msra.mxu2 %v32_v18  ;;  %67 = vmatpush.msra.mxu0 %v32_v18 }
  0x15   :  { %150 = vmatpush.msra.mxu3 %v48_v19  ;;  %90 = vmatpush.msra.mxu1 %v48_v19 }
  0x16   :  { %135 = vmatpush.msra.mxu2 %v31_v20  ;;  %68 = vmatpush.msra.mxu0 %v31_v20 }
  0x17   :  { %151 = vmatpush.msra.mxu3 %v47_v21  ;;  %91 = vmatpush.msra.mxu1 %v47_v21 }
  0x18   :  { %136 = vmatpush.msra.mxu2 %v30_v22  ;;  %69 = vmatpush.msra.mxu0 %v30_v22 }
  0x19   :  { %152 = vmatpush.msra.mxu3 %v46_v23  ;;  %92 = vmatpush.msra.mxu1 %v46_v23 }
  0x1a   :  { %137 = vmatpush.msra.mxu2 %v29_v24  ;;  %70 = vmatpush.msra.mxu0 %v29_v24 }
  0x1b   :  { %153 = vmatpush.msra.mxu3 %v45_v25  ;;  %93 = vmatpush.msra.mxu1 %v45_v25 }
  0x1c   :  { %138 = vmatpush.msra.mxu2 %v28_v26  ;;  %71 = vmatpush.msra.mxu0 %v28_v26 }
  0x1d   :  { %154 = vmatpush.msra.mxu3 %v44_v27  ;;  %94 = vmatpush.msra.mxu1 %v44_v27 }
  0x1e   :  { %139 = vmatpush.msra.mxu2 %v27_v28  ;;  %72 = vmatpush.msra.mxu0 %v27_v28 }
  0x1f   :  { %155 = vmatpush.msra.mxu3 %v43_v29  ;;  %95 = vmatpush.msra.mxu1 %v43_v29 }
  0x20   :  { %140 = vmatpush.msra.mxu2 %v26_v30  ;;  %73 = vmatpush.msra.mxu0 %v26_v30 }
  0x21   :  { %156 = vmatpush.msra.mxu3 %v42_v31  ;;  %77 = vmatmul.f32.vlgmr.msra.gmra.mxu2 %v24_v32 }
  0x22   :  { %100 = vmatmul.f32.vlgmr.msra.gmra.mxu3 %v25_v33  ;;  %96 = vmatpush.msra.mxu1 %v42_v31 }
  0x23   :  { %74 = vmatmul.f32.vlgmr.msra.gmra.mxu0 %v22_v34  ;;  %97 = vmatmul.f32.vlgmr.msra.gmra.mxu1 %v23_v35 }
  0xa0   :  { %v75_v37 = vpop.f32.mrf.mxu0  ;;  %v98_v38 = vpop.f32.mrf.mxu1 }
  0xa1   :  { %v99_v39 = vadd.f32 %v98_v38, %v75_v37 }
  0xa3   :  { %v117_v40 = vadd.f32 %v157_v36, %v99_v39 }
  0xa4   :  { %v78_v41 = vpop.f32.mrf.mxu2 }
  0xa5   :  { %v101_v42 = vpop.f32.mrf.mxu3  ;;  %119 = vst [vmem:[%s298_s3] sm:$0xff] %v117_v40 }
  0xa6   :  { %v102_v43 = vadd.f32 %v101_v42, %v78_v41 }
  0xa8   :  { %v118_v44 = vadd.f32 %v157_v36, %v102_v43 }
  0xaa   :  { %120 = vst [vmem:[%s298_s3 + $0x8] sm:$0xff] %v118_v44 }

</bundles_post_ra>
